<compile_context>
chip_gen: v7x
topology: tpu7x:2x2x1
jax: 0.10.0
libtpu: 0.0.40
codegen_flags: <defaults>
</compile_context>

<pallas_src>
import functools
import math

import jax
import jax.numpy as jnp
from jax.experimental import pallas as pl
from jax.experimental.pallas import tpu as pltpu  # noqa: F401  (TPU backend)


# ----------------------------- config ---------------------------------------
class Config:
    vocab_size = 256
    n_positions = 32
    n_ctx = 32
    n_embd = 32
    n_head = 4
    n_layer = 2
    layer_norm_epsilon = 1e-5


# ----------------------------- fused Pallas kernel --------------------------
def _gpt2_kernel(tok_ref, pos_ref, wte_ref, wpe_ref,
                 ln1_g_ref, ln1_b_ref, w_attn_ref, b_attn_ref,
                 w_proj_ref, b_proj_ref,
                 ln2_g_ref, ln2_b_ref, w_fc_ref, b_fc_ref,
                 w_fc2_ref, b_fc2_ref,
                 lnf_g_ref, lnf_b_ref,
                 logits_ref, kv_ref,
                 *, n_layer, n_head, eps):
    T = tok_ref.shape[0]
    V, D = wte_ref.shape
    P = wpe_ref.shape[0]
    hd = D // n_head
    f32 = jnp.float32

    def layer_norm(x, g, b):
        u = jnp.mean(x, axis=-1, keepdims=True)
        s = jnp.mean((x - u) ** 2, axis=-1, keepdims=True)
        return g * ((x - u) * jax.lax.rsqrt(s + eps)) + b

    # ---- embeddings: one-hot gather as MXU matmuls, all in VMEM -------------
    tok = tok_ref[...]                                     # (T, 1) int32
    pos = pos_ref[...]                                     # (T, 1) int32
    tok_oh = (tok == jax.lax.broadcasted_iota(jnp.int32, (T, V), 1)).astype(f32)
    pos_oh = (pos == jax.lax.broadcasted_iota(jnp.int32, (T, P), 1)).astype(f32)
    h = (jnp.dot(tok_oh, wte_ref[...], preferred_element_type=f32)
         + jnp.dot(pos_oh, wpe_ref[...], preferred_element_type=f32))   # (T, D)

    # ---- causal mask built in-kernel ----------------------------------------
    row = jax.lax.broadcasted_iota(jnp.int32, (T, T), 0)
    col = jax.lax.broadcasted_iota(jnp.int32, (T, T), 1)
    causal = row >= col                                    # (T, T) bool

    scale = 1.0 / math.sqrt(hd)
    gelu_c = math.sqrt(2.0 / math.pi)

    kv_cols = []                                           # packed present K/V
    for l in range(n_layer):                               # static unroll
        # ---- attention ------------------------------------------------------
        a_in = layer_norm(h, ln1_g_ref[l], ln1_b_ref[l])
        qkv = (jnp.dot(a_in, w_attn_ref[l], preferred_element_type=f32)
               + b_attn_ref[l])                            # (T, 3D)
        q = qkv[:, :D]
        k = qkv[:, D:2 * D]
        v = qkv[:, 2 * D:]
        kv_cols.append(k)                                  # layer-major, K then V
        kv_cols.append(v)

        head_outs = []
        for hh in range(n_head):                           # per-head lane slices
            qh = q[:, hh * hd:(hh + 1) * hd]               # (T, hd)
            kh = k[:, hh * hd:(hh + 1) * hd]               # (T, hd)
            vh = v[:, hh * hd:(hh + 1) * hd]               # (T, hd)
            w = jax.lax.dot_general(
                qh, kh, dimension_numbers=(((1,), (1,)), ((), ())),
                preferred_element_type=f32)                # (T, T)
            w = jnp.where(causal, w * scale, -1e10)
            w = w - jnp.max(w, axis=-1, keepdims=True)
            e = jnp.exp(w)
            p = e * pl.reciprocal(jnp.sum(e, axis=-1, keepdims=True), approx=True)
            head_outs.append(jnp.dot(p, vh, preferred_element_type=f32))
        a = jnp.concatenate(head_outs, axis=-1)            # (T, D) merge_heads

        h = h + (jnp.dot(a, w_proj_ref[l], preferred_element_type=f32)
                 + b_proj_ref[l])                          # c_proj + residual

        # ---- MLP -------------------------------------------------------------
        m_in = layer_norm(h, ln2_g_ref[l], ln2_b_ref[l])
        fc = (jnp.dot(m_in, w_fc_ref[l], preferred_element_type=f32)
              + b_fc_ref[l])                               # (T, 4D)
        fc = 0.5 * fc * (1.0 + jnp.tanh(gelu_c * (fc + 0.044715 * fc ** 3)))
        h = h + (jnp.dot(fc, w_fc2_ref[l], preferred_element_type=f32)
                 + b_fc2_ref[l])                           # c_proj + residual

    # ---- presents: single lane-dense store (T, L*2*D) ------------------------
    kv_ref[...] = jnp.concatenate(kv_cols, axis=-1)

    # ---- final LN + tied LM head (contract directly against wte) ------------
    h = layer_norm(h, lnf_g_ref[...], lnf_b_ref[...])
    logits_ref[...] = jax.lax.dot_general(
        h, wte_ref[...], dimension_numbers=(((1,), (1,)), ((), ())),
        preferred_element_type=f32).astype(logits_ref.dtype)   # (T, V) lane-dense


# ----------------------------- wrapper ---------------------------------------
def gpt2_forward(params, tokens, positions, cfg):
    T = tokens.shape[-1]
    D, V, P = cfg.n_embd, cfg.vocab_size, cfg.n_positions
    H, L = cfg.n_head, cfg.n_layer
    hd = D // H

    layers = params["layers"]
    stack_mat = lambda name: jnp.stack([lp[name] for lp in layers])              # (L, ., .)
    stack_vec = lambda name: jnp.stack([lp[name] for lp in layers])[:, None, :]  # (L, 1, .)

    args = (
        tokens.reshape(T, 1).astype(jnp.int32),
        positions.reshape(T, 1).astype(jnp.int32),
        params["wte"], params["wpe"],
        stack_vec("ln1_g"), stack_vec("ln1_b"),
        stack_mat("w_attn"), stack_vec("b_attn"),
        stack_mat("w_proj"), stack_vec("b_proj"),
        stack_vec("ln2_g"), stack_vec("ln2_b"),
        stack_mat("w_fc"), stack_vec("b_fc"),
        stack_mat("w_fc2"), stack_vec("b_fc2"),
        params["lnf_g"].reshape(1, D), params["lnf_b"].reshape(1, D),
    )

    logits, kv_packed = pl.pallas_call(
        functools.partial(_gpt2_kernel, n_layer=L, n_head=H,
                          eps=cfg.layer_norm_epsilon),
        out_shape=(jax.ShapeDtypeStruct((T, V), jnp.float32),
                   jax.ShapeDtypeStruct((T, L * 2 * D), jnp.float32)),
    )(*args)

    # kv_packed columns: [l0_K | l0_V | l1_K | l1_V | ...]  -> (T, L, 2, D)
    kv = kv_packed.reshape(T, L, 2, D)

    # presents[l] = stack(present_key.transpose(-2,-1), present_value) -> (2,1,H,T,hd)
    presents = []
    for l in range(L):
        kh = kv[:, l, 0, :].reshape(T, H, hd).transpose(1, 0, 2)[None]  # (1,H,T,hd)
        vh = kv[:, l, 1, :].reshape(T, H, hd).transpose(1, 0, 2)[None]
        presents.append(jnp.stack([kh, vh]))                            # (2,1,H,T,hd)

    return logits.reshape(1, T, V), presents


# ----------------------------- pure-JAX reference ----------------------------
def _ref_gelu(x):
    return 0.5 * x * (1 + jnp.tanh(math.sqrt(2 / math.pi) * (x + 0.044715 * x ** 3)))


def ref_forward(params, tokens, positions, cfg):
    T = tokens.shape[-1]
    D, H = cfg.n_embd, cfg.n_head
    hd = D // H
    eps = cfg.layer_norm_epsilon

    def ln(x, g, b):
        u = jnp.mean(x, -1, keepdims=True)
        s = jnp.mean((x - u) ** 2, -1, keepdims=True)
        return g * ((x - u) / jnp.sqrt(s + eps)) + b

    h = params["wte"][tokens[0]] + params["wpe"][positions[0]]
    mask = jnp.tril(jnp.ones((cfg.n_ctx, cfg.n_ctx), jnp.float32))[:T, :T]
    presents = []
    for p in params["layers"]:
        a_in = ln(h, p["ln1_g"], p["ln1_b"])
        qkv = a_in @ p["w_attn"] + p["b_attn"]
        q, k, v = jnp.split(qkv, 3, axis=-1)
        qh = q.reshape(T, H, hd).transpose(1, 0, 2)
        kT = k.reshape(T, H, hd).transpose(1, 2, 0)
        vh = v.reshape(T, H, hd).transpose(1, 0, 2)
        presents.append(jnp.stack([kT.transpose(0, 2, 1)[None], vh[None]]))
        w = jnp.einsum("htd,hds->hts", qh, kT) / math.sqrt(hd)
        w = w * mask - 1e10 * (1.0 - mask)
        w = jax.nn.softmax(w, axis=-1)
        a = jnp.einsum("hts,hsd->htd", w, vh).transpose(1, 0, 2).reshape(T, D)
        h = h + (a @ p["w_proj"] + p["b_proj"])
        m_in = ln(h, p["ln2_g"], p["ln2_b"])
        h = h + (_ref_gelu(m_in @ p["w_fc"] + p["b_fc"]) @ p["w_fc2"] + p["b_fc2"])
    h = ln(h, params["lnf_g"], params["lnf_b"])
    return (h @ params["wte"].T).reshape(1, T, cfg.vocab_size), presents


# ----------------------------- param init ------------------------------------
def init_params(key, cfg):
    D, V, P = cfg.n_embd, cfg.vocab_size, cfg.n_positions
    ks = iter(jax.random.split(key, 8 + 4 * cfg.n_layer))

    def nrm(k, shape):
        return (0.02 * jax.random.normal(k, shape)).astype(jnp.float32)

    params = {
        "wte": nrm(next(ks), (V, D)),
        "wpe": nrm(next(ks), (P, D)),
        "lnf_g": jnp.ones((D,), jnp.float32),
        "lnf_b": jnp.zeros((D,), jnp.float32),
        "layers": [],
    }
    for _ in range(cfg.n_layer):
        params["layers"].append({
            "ln1_g": jnp.ones((D,), jnp.float32),
            "ln1_b": jnp.zeros((D,), jnp.float32),
            "w_attn": nrm(next(ks), (D, 3 * D)),
            "b_attn": jnp.zeros((3 * D,), jnp.float32),
            "w_proj": nrm(next(ks), (D, D)),
            "b_proj": jnp.zeros((D,), jnp.float32),
            "ln2_g": jnp.ones((D,), jnp.float32),
            "ln2_b": jnp.zeros((D,), jnp.float32),
            "w_fc": nrm(next(ks), (D, 4 * D)),
            "b_fc": jnp.zeros((4 * D,), jnp.float32),
            "w_fc2": nrm(next(ks), (4 * D, D)),
            "b_fc2": jnp.zeros((D,), jnp.float32),
        })
    return params


# ----------------------------- main -------------------------------------------
if __name__ == "__main__":
    cfg = Config()
    key = jax.random.PRNGKey(0)
    pkey, tkey = jax.random.split(key)
    params = init_params(pkey, cfg)

    T = 8
    tokens = jax.random.randint(tkey, (1, T), 0, cfg.vocab_size, dtype=jnp.int32)
    positions = jnp.arange(T, dtype=jnp.int32)[None, :]

    fwd = jax.jit(functools.partial(gpt2_forward, cfg=cfg))
    logits, presents = fwd(params, tokens, positions)
    logits = jax.block_until_ready(logits)
    presents = jax.block_until_ready(presents)

    ref_logits, ref_presents = ref_forward(params, tokens, positions, cfg)

    assert logits.shape == (1, T, cfg.vocab_size)
    assert presents[0].shape == (2, 1, cfg.n_head, T, cfg.n_embd // cfg.n_head)
    assert bool(jnp.all(jnp.isfinite(logits)))
    assert bool(jnp.allclose(logits, ref_logits, atol=1e-2, rtol=1e-2)), \
        f"max abs err {float(jnp.max(jnp.abs(logits - ref_logits)))}"
    for l in range(cfg.n_layer):
        assert bool(jnp.allclose(presents[l], ref_presents[l], atol=1e-3, rtol=1e-3)), \
            f"present mismatch at layer {l}"

    # next-token logits of the last position, as in GPT2LMHeadModel.forward
    _ = jax.block_until_ready(logits[0, -1, :])
    print("KERNEL_OK")
</pallas_src>

<mosaic_0001>
module attributes {stable_mosaic.version = 11 : i64} {
  func.func @_gpt2_kernel(%arg0: memref<8x1xi32, #tpu.memory_space<vmem>>, %arg1: memref<8x1xi32, #tpu.memory_space<vmem>>, %arg2: memref<256x32xf32, #tpu.memory_space<vmem>>, %arg3: memref<32x32xf32, #tpu.memory_space<vmem>>, %arg4: memref<2x1x32xf32, #tpu.memory_space<vmem>>, %arg5: memref<2x1x32xf32, #tpu.memory_space<vmem>>, %arg6: memref<2x32x96xf32, #tpu.memory_space<vmem>>, %arg7: memref<2x1x96xf32, #tpu.memory_space<vmem>>, %arg8: memref<2x32x32xf32, #tpu.memory_space<vmem>>, %arg9: memref<2x1x32xf32, #tpu.memory_space<vmem>>, %arg10: memref<2x1x32xf32, #tpu.memory_space<vmem>>, %arg11: memref<2x1x32xf32, #tpu.memory_space<vmem>>, %arg12: memref<2x32x128xf32, #tpu.memory_space<vmem>>, %arg13: memref<2x1x128xf32, #tpu.memory_space<vmem>>, %arg14: memref<2x128x32xf32, #tpu.memory_space<vmem>>, %arg15: memref<2x1x32xf32, #tpu.memory_space<vmem>>, %arg16: memref<1x32xf32, #tpu.memory_space<vmem>>, %arg17: memref<1x32xf32, #tpu.memory_space<vmem>>, %arg18: memref<8x256xf32, #tpu.memory_space<vmem>>, %arg19: memref<8x128xf32, #tpu.memory_space<vmem>>) attributes {dimension_semantics = [], scalar_prefetch = 0 : i64, scratch_operands = 0 : i64, tpu.core_type = #tpu.core_type<tc>} {
    %c0 = arith.constant 0 : index
    %c0_0 = arith.constant 0 : index
    %0 = vector.load %arg0[%c0, %c0_0] : memref<8x1xi32, #tpu.memory_space<vmem>>, vector<8x1xi32>
    %c0_1 = arith.constant 0 : index
    %c0_2 = arith.constant 0 : index
    %1 = vector.load %arg1[%c0_1, %c0_2] : memref<8x1xi32, #tpu.memory_space<vmem>>, vector<8x1xi32>
    %2 = tpu.iota {dimensions = array<i32: 1>} : vector<8x256xi32>
    %3 = vector.broadcast %0 : vector<8x1xi32> to vector<8x256xi32>
    %4 = arith.cmpi eq, %3, %2 : vector<8x256xi32>
    %5 = arith.extui %4 : vector<8x256xi1> to vector<8x256xi32>
    %6 = arith.sitofp %5 : vector<8x256xi32> to vector<8x256xf32>
    %7 = tpu.iota {dimensions = array<i32: 1>} : vector<8x32xi32>
    %8 = vector.broadcast %1 : vector<8x1xi32> to vector<8x32xi32>
    %9 = arith.cmpi eq, %8, %7 : vector<8x32xi32>
    %10 = arith.extui %9 : vector<8x32xi1> to vector<8x32xi32>
    %11 = arith.sitofp %10 : vector<8x32xi32> to vector<8x32xf32>
    %c0_3 = arith.constant 0 : index
    %c0_4 = arith.constant 0 : index
    %12 = vector.load %arg2[%c0_3, %c0_4] : memref<256x32xf32, #tpu.memory_space<vmem>>, vector<256x32xf32>
    %cst = arith.constant dense<0.000000e+00> : vector<8x32xf32>
    %13 = tpu.matmul %6, %12, %cst {dimension_numbers = #tpu.dot_dimension_numbers<[1], [0], [0], [1], [0, 0, 1, 1], [], []>} : vector<8x256xf32>, vector<256x32xf32>, vector<8x32xf32> -> vector<8x32xf32>
    %c0_5 = arith.constant 0 : index
    %c0_6 = arith.constant 0 : index
    %14 = vector.load %arg3[%c0_5, %c0_6] : memref<32x32xf32, #tpu.memory_space<vmem>>, vector<32x32xf32>
    %cst_7 = arith.constant dense<0.000000e+00> : vector<8x32xf32>
    %15 = tpu.matmul %11, %14, %cst_7 {dimension_numbers = #tpu.dot_dimension_numbers<[1], [0], [0], [1], [0, 0, 1, 1], [], []>} : vector<8x32xf32>, vector<32x32xf32>, vector<8x32xf32> -> vector<8x32xf32>
    %16 = arith.addf %13, %15 : vector<8x32xf32>
    %17 = tpu.iota {dimensions = array<i32: 0>} : vector<8x8xi32>
    %18 = tpu.iota {dimensions = array<i32: 1>} : vector<8x8xi32>
    %19 = arith.cmpi sge, %17, %18 : vector<8x8xi32>
    %c0_8 = arith.constant 0 : index
    %c0_9 = arith.constant 0 : index
    %c0_10 = arith.constant 0 : index
    %20 = vector.load %arg4[%c0_8, %c0_9, %c0_10] : memref<2x1x32xf32, #tpu.memory_space<vmem>>, vector<1x1x32xf32>
    %21 = vector.shape_cast %20 : vector<1x1x32xf32> to vector<1x32xf32>
    %c0_11 = arith.constant 0 : index
    %c0_12 = arith.constant 0 : index
    %c0_13 = arith.constant 0 : index
    %22 = vector.load %arg5[%c0_11, %c0_12, %c0_13] : memref<2x1x32xf32, #tpu.memory_space<vmem>>, vector<1x1x32xf32>
    %23 = vector.shape_cast %22 : vector<1x1x32xf32> to vector<1x32xf32>
    %cst_14 = arith.constant dense<0.000000e+00> : vector<8xf32>
    %24 = vector.multi_reduction <add>, %16, %cst_14 [1] : vector<8x32xf32> to vector<8xf32>
    %25 = vector.shape_cast %24 : vector<8xf32> to vector<8x1xf32>
    %cst_15 = arith.constant 3.200000e+01 : f32
    %26 = vector.broadcast %cst_15 : f32 to vector<8x1xf32>
    %27 = arith.divf %25, %26 : vector<8x1xf32>
    %28 = vector.broadcast %27 : vector<8x1xf32> to vector<8x32xf32>
    %29 = arith.subf %16, %28 : vector<8x32xf32>
    %30 = arith.mulf %29, %29 : vector<8x32xf32>
    %cst_16 = arith.constant dense<0.000000e+00> : vector<8xf32>
    %31 = vector.multi_reduction <add>, %30, %cst_16 [1] : vector<8x32xf32> to vector<8xf32>
    %32 = vector.shape_cast %31 : vector<8xf32> to vector<8x1xf32>
    %cst_17 = arith.constant 3.200000e+01 : f32
    %33 = vector.broadcast %cst_17 : f32 to vector<8x1xf32>
    %34 = arith.divf %32, %33 : vector<8x1xf32>
    %35 = vector.broadcast %27 : vector<8x1xf32> to vector<8x32xf32>
    %36 = arith.subf %16, %35 : vector<8x32xf32>
    %cst_18 = arith.constant 9.99999974E-6 : f32
    %37 = vector.broadcast %cst_18 : f32 to vector<8x1xf32>
    %38 = arith.addf %34, %37 : vector<8x1xf32>
    %39 = math.rsqrt %38 : vector<8x1xf32>
    %40 = vector.broadcast %39 : vector<8x1xf32> to vector<8x32xf32>
    %41 = arith.mulf %36, %40 : vector<8x32xf32>
    %42 = vector.broadcast %21 : vector<1x32xf32> to vector<8x32xf32>
    %43 = arith.mulf %42, %41 : vector<8x32xf32>
    %44 = vector.broadcast %23 : vector<1x32xf32> to vector<8x32xf32>
    %45 = arith.addf %43, %44 : vector<8x32xf32>
    %c0_19 = arith.constant 0 : index
    %c0_20 = arith.constant 0 : index
    %c0_21 = arith.constant 0 : index
    %46 = vector.load %arg6[%c0_19, %c0_20, %c0_21] : memref<2x32x96xf32, #tpu.memory_space<vmem>>, vector<1x32x96xf32>
    %47 = vector.shape_cast %46 : vector<1x32x96xf32> to vector<32x96xf32>
    %cst_22 = arith.constant dense<0.000000e+00> : vector<8x96xf32>
    %48 = tpu.matmul %45, %47, %cst_22 {dimension_numbers = #tpu.dot_dimension_numbers<[1], [0], [0], [1], [0, 0, 1, 1], [], []>} : vector<8x32xf32>, vector<32x96xf32>, vector<8x96xf32> -> vector<8x96xf32>
    %c0_23 = arith.constant 0 : index
    %c0_24 = arith.constant 0 : index
    %c0_25 = arith.constant 0 : index
    %49 = vector.load %arg7[%c0_23, %c0_24, %c0_25] : memref<2x1x96xf32, #tpu.memory_space<vmem>>, vector<1x1x96xf32>
    %50 = vector.shape_cast %49 : vector<1x1x96xf32> to vector<1x96xf32>
    %51 = vector.broadcast %50 : vector<1x96xf32> to vector<8x96xf32>
    %52 = arith.addf %48, %51 : vector<8x96xf32>
    %53 = vector.extract_strided_slice %52 {offsets = [0, 0], sizes = [8, 32], strides = [1, 1]} : vector<8x96xf32> to vector<8x32xf32>
    %54 = vector.extract_strided_slice %52 {offsets = [0, 32], sizes = [8, 32], strides = [1, 1]} : vector<8x96xf32> to vector<8x32xf32>
    %55 = vector.extract_strided_slice %52 {offsets = [0, 64], sizes = [8, 32], strides = [1, 1]} : vector<8x96xf32> to vector<8x32xf32>
    %56 = vector.extract_strided_slice %53 {offsets = [0, 0], sizes = [8, 8], strides = [1, 1]} : vector<8x32xf32> to vector<8x8xf32>
    %57 = vector.extract_strided_slice %54 {offsets = [0, 0], sizes = [8, 8], strides = [1, 1]} : vector<8x32xf32> to vector<8x8xf32>
    %58 = vector.extract_strided_slice %55 {offsets = [0, 0], sizes = [8, 8], strides = [1, 1]} : vector<8x32xf32> to vector<8x8xf32>
    %cst_26 = arith.constant dense<0.000000e+00> : vector<8x8xf32>
    %59 = tpu.matmul %56, %57, %cst_26 {dimension_numbers = #tpu.dot_dimension_numbers<[1], [1], [0], [0], [0, 0, 1, 0], [], []>} : vector<8x8xf32>, vector<8x8xf32>, vector<8x8xf32> -> vector<8x8xf32>
    %cst_27 = arith.constant 0.353553385 : f32
    %60 = vector.broadcast %cst_27 : f32 to vector<8x8xf32>
    %61 = arith.mulf %59, %60 : vector<8x8xf32>
    %cst_28 = arith.constant -1.000000e+10 : f32
    %62 = vector.broadcast %cst_28 : f32 to vector<8x8xf32>
    %63 = arith.select %19, %61, %62 : vector<8x8xi1>, vector<8x8xf32>
    %cst_29 = arith.constant dense<0xFF800000> : vector<8xf32>
    %64 = vector.multi_reduction <maximumf>, %63, %cst_29 [1] : vector<8x8xf32> to vector<8xf32>
    %65 = vector.shape_cast %64 : vector<8xf32> to vector<8x1xf32>
    %66 = vector.broadcast %65 : vector<8x1xf32> to vector<8x8xf32>
    %67 = arith.subf %63, %66 : vector<8x8xf32>
    %68 = math.exp %67 : vector<8x8xf32>
    %cst_30 = arith.constant dense<0.000000e+00> : vector<8xf32>
    %69 = vector.multi_reduction <add>, %68, %cst_30 [1] : vector<8x8xf32> to vector<8xf32>
    %70 = vector.shape_cast %69 : vector<8xf32> to vector<8x1xf32>
    %71 = tpu.reciprocal %70 {approx = true} : vector<8x1xf32> -> vector<8x1xf32>
    %72 = vector.broadcast %71 : vector<8x1xf32> to vector<8x8xf32>
    %73 = arith.mulf %68, %72 : vector<8x8xf32>
    %cst_31 = arith.constant dense<0.000000e+00> : vector<8x8xf32>
    %74 = tpu.matmul %73, %58, %cst_31 {dimension_numbers = #tpu.dot_dimension_numbers<[1], [0], [0], [1], [0, 0, 1, 1], [], []>} : vector<8x8xf32>, vector<8x8xf32>, vector<8x8xf32> -> vector<8x8xf32>
    %75 = vector.extract_strided_slice %53 {offsets = [0, 8], sizes = [8, 8], strides = [1, 1]} : vector<8x32xf32> to vector<8x8xf32>
    %76 = vector.extract_strided_slice %54 {offsets = [0, 8], sizes = [8, 8], strides = [1, 1]} : vector<8x32xf32> to vector<8x8xf32>
    %77 = vector.extract_strided_slice %55 {offsets = [0, 8], sizes = [8, 8], strides = [1, 1]} : vector<8x32xf32> to vector<8x8xf32>
    %cst_32 = arith.constant dense<0.000000e+00> : vector<8x8xf32>
    %78 = tpu.matmul %75, %76, %cst_32 {dimension_numbers = #tpu.dot_dimension_numbers<[1], [1], [0], [0], [0, 0, 1, 0], [], []>} : vector<8x8xf32>, vector<8x8xf32>, vector<8x8xf32> -> vector<8x8xf32>
    %cst_33 = arith.constant 0.353553385 : f32
    %79 = vector.broadcast %cst_33 : f32 to vector<8x8xf32>
    %80 = arith.mulf %78, %79 : vector<8x8xf32>
    %cst_34 = arith.constant -1.000000e+10 : f32
    %81 = vector.broadcast %cst_34 : f32 to vector<8x8xf32>
    %82 = arith.select %19, %80, %81 : vector<8x8xi1>, vector<8x8xf32>
    %cst_35 = arith.constant dense<0xFF800000> : vector<8xf32>
    %83 = vector.multi_reduction <maximumf>, %82, %cst_35 [1] : vector<8x8xf32> to vector<8xf32>
    %84 = vector.shape_cast %83 : vector<8xf32> to vector<8x1xf32>
    %85 = vector.broadcast %84 : vector<8x1xf32> to vector<8x8xf32>
    %86 = arith.subf %82, %85 : vector<8x8xf32>
    %87 = math.exp %86 : vector<8x8xf32>
    %cst_36 = arith.constant dense<0.000000e+00> : vector<8xf32>
    %88 = vector.multi_reduction <add>, %87, %cst_36 [1] : vector<8x8xf32> to vector<8xf32>
    %89 = vector.shape_cast %88 : vector<8xf32> to vector<8x1xf32>
    %90 = tpu.reciprocal %89 {approx = true} : vector<8x1xf32> -> vector<8x1xf32>
    %91 = vector.broadcast %90 : vector<8x1xf32> to vector<8x8xf32>
    %92 = arith.mulf %87, %91 : vector<8x8xf32>
    %cst_37 = arith.constant dense<0.000000e+00> : vector<8x8xf32>
    %93 = tpu.matmul %92, %77, %cst_37 {dimension_numbers = #tpu.dot_dimension_numbers<[1], [0], [0], [1], [0, 0, 1, 1], [], []>} : vector<8x8xf32>, vector<8x8xf32>, vector<8x8xf32> -> vector<8x8xf32>
    %94 = vector.extract_strided_slice %53 {offsets = [0, 16], sizes = [8, 8], strides = [1, 1]} : vector<8x32xf32> to vector<8x8xf32>
    %95 = vector.extract_strided_slice %54 {offsets = [0, 16], sizes = [8, 8], strides = [1, 1]} : vector<8x32xf32> to vector<8x8xf32>
    %96 = vector.extract_strided_slice %55 {offsets = [0, 16], sizes = [8, 8], strides = [1, 1]} : vector<8x32xf32> to vector<8x8xf32>
    %cst_38 = arith.constant dense<0.000000e+00> : vector<8x8xf32>
    %97 = tpu.matmul %94, %95, %cst_38 {dimension_numbers = #tpu.dot_dimension_numbers<[1], [1], [0], [0], [0, 0, 1, 0], [], []>} : vector<8x8xf32>, vector<8x8xf32>, vector<8x8xf32> -> vector<8x8xf32>
    %cst_39 = arith.constant 0.353553385 : f32
    %98 = vector.broadcast %cst_39 : f32 to vector<8x8xf32>
    %99 = arith.mulf %97, %98 : vector<8x8xf32>
    %cst_40 = arith.constant -1.000000e+10 : f32
    %100 = vector.broadcast %cst_40 : f32 to vector<8x8xf32>
    %101 = arith.select %19, %99, %100 : vector<8x8xi1>, vector<8x8xf32>
    %cst_41 = arith.constant dense<0xFF800000> : vector<8xf32>
    %102 = vector.multi_reduction <maximumf>, %101, %cst_41 [1] : vector<8x8xf32> to vector<8xf32>
    %103 = vector.shape_cast %102 : vector<8xf32> to vector<8x1xf32>
    %104 = vector.broadcast %103 : vector<8x1xf32> to vector<8x8xf32>
    %105 = arith.subf %101, %104 : vector<8x8xf32>
    %106 = math.exp %105 : vector<8x8xf32>
    %cst_42 = arith.constant dense<0.000000e+00> : vector<8xf32>
    %107 = vector.multi_reduction <add>, %106, %cst_42 [1] : vector<8x8xf32> to vector<8xf32>
    %108 = vector.shape_cast %107 : vector<8xf32> to vector<8x1xf32>
    %109 = tpu.reciprocal %108 {approx = true} : vector<8x1xf32> -> vector<8x1xf32>
    %110 = vector.broadcast %109 : vector<8x1xf32> to vector<8x8xf32>
    %111 = arith.mulf %106, %110 : vector<8x8xf32>
    %cst_43 = arith.constant dense<0.000000e+00> : vector<8x8xf32>
    %112 = tpu.matmul %111, %96, %cst_43 {dimension_numbers = #tpu.dot_dimension_numbers<[1], [0], [0], [1], [0, 0, 1, 1], [], []>} : vector<8x8xf32>, vector<8x8xf32>, vector<8x8xf32> -> vector<8x8xf32>
    %113 = vector.extract_strided_slice %53 {offsets = [0, 24], sizes = [8, 8], strides = [1, 1]} : vector<8x32xf32> to vector<8x8xf32>
    %114 = vector.extract_strided_slice %54 {offsets = [0, 24], sizes = [8, 8], strides = [1, 1]} : vector<8x32xf32> to vector<8x8xf32>
    %115 = vector.extract_strided_slice %55 {offsets = [0, 24], sizes = [8, 8], strides = [1, 1]} : vector<8x32xf32> to vector<8x8xf32>
    %cst_44 = arith.constant dense<0.000000e+00> : vector<8x8xf32>
    %116 = tpu.matmul %113, %114, %cst_44 {dimension_numbers = #tpu.dot_dimension_numbers<[1], [1], [0], [0], [0, 0, 1, 0], [], []>} : vector<8x8xf32>, vector<8x8xf32>, vector<8x8xf32> -> vector<8x8xf32>
    %cst_45 = arith.constant 0.353553385 : f32
    %117 = vector.broadcast %cst_45 : f32 to vector<8x8xf32>
    %118 = arith.mulf %116, %117 : vector<8x8xf32>
    %cst_46 = arith.constant -1.000000e+10 : f32
    %119 = vector.broadcast %cst_46 : f32 to vector<8x8xf32>
    %120 = arith.select %19, %118, %119 : vector<8x8xi1>, vector<8x8xf32>
    %cst_47 = arith.constant dense<0xFF800000> : vector<8xf32>
    %121 = vector.multi_reduction <maximumf>, %120, %cst_47 [1] : vector<8x8xf32> to vector<8xf32>
    %122 = vector.shape_cast %121 : vector<8xf32> to vector<8x1xf32>
    %123 = vector.broadcast %122 : vector<8x1xf32> to vector<8x8xf32>
    %124 = arith.subf %120, %123 : vector<8x8xf32>
    %125 = math.exp %124 : vector<8x8xf32>
    %cst_48 = arith.constant dense<0.000000e+00> : vector<8xf32>
    %126 = vector.multi_reduction <add>, %125, %cst_48 [1] : vector<8x8xf32> to vector<8xf32>
    %127 = vector.shape_cast %126 : vector<8xf32> to vector<8x1xf32>
    %128 = tpu.reciprocal %127 {approx = true} : vector<8x1xf32> -> vector<8x1xf32>
    %129 = vector.broadcast %128 : vector<8x1xf32> to vector<8x8xf32>
    %130 = arith.mulf %125, %129 : vector<8x8xf32>
    %cst_49 = arith.constant dense<0.000000e+00> : vector<8x8xf32>
    %131 = tpu.matmul %130, %115, %cst_49 {dimension_numbers = #tpu.dot_dimension_numbers<[1], [0], [0], [1], [0, 0, 1, 1], [], []>} : vector<8x8xf32>, vector<8x8xf32>, vector<8x8xf32> -> vector<8x8xf32>
    %132 = tpu.concatenate %74, %93, %112, %131 in 1 : vector<8x8xf32>, vector<8x8xf32>, vector<8x8xf32>, vector<8x8xf32> -> vector<8x32xf32>
    %c0_50 = arith.constant 0 : index
    %c0_51 = arith.constant 0 : index
    %c0_52 = arith.constant 0 : index
    %133 = vector.load %arg8[%c0_50, %c0_51, %c0_52] : memref<2x32x32xf32, #tpu.memory_space<vmem>>, vector<1x32x32xf32>
    %134 = vector.shape_cast %133 : vector<1x32x32xf32> to vector<32x32xf32>
    %cst_53 = arith.constant dense<0.000000e+00> : vector<8x32xf32>
    %135 = tpu.matmul %132, %134, %cst_53 {dimension_numbers = #tpu.dot_dimension_numbers<[1], [0], [0], [1], [0, 0, 1, 1], [], []>} : vector<8x32xf32>, vector<32x32xf32>, vector<8x32xf32> -> vector<8x32xf32>
    %c0_54 = arith.constant 0 : index
    %c0_55 = arith.constant 0 : index
    %c0_56 = arith.constant 0 : index
    %136 = vector.load %arg9[%c0_54, %c0_55, %c0_56] : memref<2x1x32xf32, #tpu.memory_space<vmem>>, vector<1x1x32xf32>
    %137 = vector.shape_cast %136 : vector<1x1x32xf32> to vector<1x32xf32>
    %138 = vector.broadcast %137 : vector<1x32xf32> to vector<8x32xf32>
    %139 = arith.addf %135, %138 : vector<8x32xf32>
    %140 = arith.addf %16, %139 : vector<8x32xf32>
    %c0_57 = arith.constant 0 : index
    %c0_58 = arith.constant 0 : index
    %c0_59 = arith.constant 0 : index
    %141 = vector.load %arg10[%c0_57, %c0_58, %c0_59] : memref<2x1x32xf32, #tpu.memory_space<vmem>>, vector<1x1x32xf32>
    %142 = vector.shape_cast %141 : vector<1x1x32xf32> to vector<1x32xf32>
    %c0_60 = arith.constant 0 : index
    %c0_61 = arith.constant 0 : index
    %c0_62 = arith.constant 0 : index
    %143 = vector.load %arg11[%c0_60, %c0_61, %c0_62] : memref<2x1x32xf32, #tpu.memory_space<vmem>>, vector<1x1x32xf32>
    %144 = vector.shape_cast %143 : vector<1x1x32xf32> to vector<1x32xf32>
    %cst_63 = arith.constant dense<0.000000e+00> : vector<8xf32>
    %145 = vector.multi_reduction <add>, %140, %cst_63 [1] : vector<8x32xf32> to vector<8xf32>
    %146 = vector.shape_cast %145 : vector<8xf32> to vector<8x1xf32>
    %cst_64 = arith.constant 3.200000e+01 : f32
    %147 = vector.broadcast %cst_64 : f32 to vector<8x1xf32>
    %148 = arith.divf %146, %147 : vector<8x1xf32>
    %149 = vector.broadcast %148 : vector<8x1xf32> to vector<8x32xf32>
    %150 = arith.subf %140, %149 : vector<8x32xf32>
    %151 = arith.mulf %150, %150 : vector<8x32xf32>
    %cst_65 = arith.constant dense<0.000000e+00> : vector<8xf32>
    %152 = vector.multi_reduction <add>, %151, %cst_65 [1] : vector<8x32xf32> to vector<8xf32>
    %153 = vector.shape_cast %152 : vector<8xf32> to vector<8x1xf32>
    %cst_66 = arith.constant 3.200000e+01 : f32
    %154 = vector.broadcast %cst_66 : f32 to vector<8x1xf32>
    %155 = arith.divf %153, %154 : vector<8x1xf32>
    %156 = vector.broadcast %148 : vector<8x1xf32> to vector<8x32xf32>
    %157 = arith.subf %140, %156 : vector<8x32xf32>
    %cst_67 = arith.constant 9.99999974E-6 : f32
    %158 = vector.broadcast %cst_67 : f32 to vector<8x1xf32>
    %159 = arith.addf %155, %158 : vector<8x1xf32>
    %160 = math.rsqrt %159 : vector<8x1xf32>
    %161 = vector.broadcast %160 : vector<8x1xf32> to vector<8x32xf32>
    %162 = arith.mulf %157, %161 : vector<8x32xf32>
    %163 = vector.broadcast %142 : vector<1x32xf32> to vector<8x32xf32>
    %164 = arith.mulf %163, %162 : vector<8x32xf32>
    %165 = vector.broadcast %144 : vector<1x32xf32> to vector<8x32xf32>
    %166 = arith.addf %164, %165 : vector<8x32xf32>
    %c0_68 = arith.constant 0 : index
    %c0_69 = arith.constant 0 : index
    %c0_70 = arith.constant 0 : index
    %167 = vector.load %arg12[%c0_68, %c0_69, %c0_70] : memref<2x32x128xf32, #tpu.memory_space<vmem>>, vector<1x32x128xf32>
    %168 = vector.shape_cast %167 : vector<1x32x128xf32> to vector<32x128xf32>
    %cst_71 = arith.constant dense<0.000000e+00> : vector<8x128xf32>
    %169 = tpu.matmul %166, %168, %cst_71 {dimension_numbers = #tpu.dot_dimension_numbers<[1], [0], [0], [1], [0, 0, 1, 1], [], []>} : vector<8x32xf32>, vector<32x128xf32>, vector<8x128xf32> -> vector<8x128xf32>
    %c0_72 = arith.constant 0 : index
    %c0_73 = arith.constant 0 : index
    %c0_74 = arith.constant 0 : index
    %170 = vector.load %arg13[%c0_72, %c0_73, %c0_74] : memref<2x1x128xf32, #tpu.memory_space<vmem>>, vector<1x1x128xf32>
    %171 = vector.shape_cast %170 : vector<1x1x128xf32> to vector<1x128xf32>
    %172 = vector.broadcast %171 : vector<1x128xf32> to vector<8x128xf32>
    %173 = arith.addf %169, %172 : vector<8x128xf32>
    %cst_75 = arith.constant 5.000000e-01 : f32
    %174 = vector.broadcast %cst_75 : f32 to vector<8x128xf32>
    %175 = arith.mulf %174, %173 : vector<8x128xf32>
    %176 = arith.mulf %173, %173 : vector<8x128xf32>
    %177 = arith.mulf %173, %176 : vector<8x128xf32>
    %cst_76 = arith.constant 4.471500e-02 : f32
    %178 = vector.broadcast %cst_76 : f32 to vector<8x128xf32>
    %179 = arith.mulf %178, %177 : vector<8x128xf32>
    %180 = arith.addf %173, %179 : vector<8x128xf32>
    %cst_77 = arith.constant 0.797884583 : f32
    %181 = vector.broadcast %cst_77 : f32 to vector<8x128xf32>
    %182 = arith.mulf %181, %180 : vector<8x128xf32>
    %183 = math.tanh %182 : vector<8x128xf32>
    %cst_78 = arith.constant 1.000000e+00 : f32
    %184 = vector.broadcast %cst_78 : f32 to vector<8x128xf32>
    %185 = arith.addf %184, %183 : vector<8x128xf32>
    %186 = arith.mulf %175, %185 : vector<8x128xf32>
    %c0_79 = arith.constant 0 : index
    %c0_80 = arith.constant 0 : index
    %c0_81 = arith.constant 0 : index
    %187 = vector.load %arg14[%c0_79, %c0_80, %c0_81] : memref<2x128x32xf32, #tpu.memory_space<vmem>>, vector<1x128x32xf32>
    %188 = vector.shape_cast %187 : vector<1x128x32xf32> to vector<128x32xf32>
    %cst_82 = arith.constant dense<0.000000e+00> : vector<8x32xf32>
    %189 = tpu.matmul %186, %188, %cst_82 {dimension_numbers = #tpu.dot_dimension_numbers<[1], [0], [0], [1], [0, 0, 1, 1], [], []>} : vector<8x128xf32>, vector<128x32xf32>, vector<8x32xf32> -> vector<8x32xf32>
    %c0_83 = arith.constant 0 : index
    %c0_84 = arith.constant 0 : index
    %c0_85 = arith.constant 0 : index
    %190 = vector.load %arg15[%c0_83, %c0_84, %c0_85] : memref<2x1x32xf32, #tpu.memory_space<vmem>>, vector<1x1x32xf32>
    %191 = vector.shape_cast %190 : vector<1x1x32xf32> to vector<1x32xf32>
    %192 = vector.broadcast %191 : vector<1x32xf32> to vector<8x32xf32>
    %193 = arith.addf %189, %192 : vector<8x32xf32>
    %194 = arith.addf %140, %193 : vector<8x32xf32>
    %c1 = arith.constant 1 : index
    %c0_86 = arith.constant 0 : index
    %c0_87 = arith.constant 0 : index
    %195 = vector.load %arg4[%c1, %c0_86, %c0_87] : memref<2x1x32xf32, #tpu.memory_space<vmem>>, vector<1x1x32xf32>
    %196 = vector.shape_cast %195 : vector<1x1x32xf32> to vector<1x32xf32>
    %c1_88 = arith.constant 1 : index
    %c0_89 = arith.constant 0 : index
    %c0_90 = arith.constant 0 : index
    %197 = vector.load %arg5[%c1_88, %c0_89, %c0_90] : memref<2x1x32xf32, #tpu.memory_space<vmem>>, vector<1x1x32xf32>
    %198 = vector.shape_cast %197 : vector<1x1x32xf32> to vector<1x32xf32>
    %cst_91 = arith.constant dense<0.000000e+00> : vector<8xf32>
    %199 = vector.multi_reduction <add>, %194, %cst_91 [1] : vector<8x32xf32> to vector<8xf32>
    %200 = vector.shape_cast %199 : vector<8xf32> to vector<8x1xf32>
    %cst_92 = arith.constant 3.200000e+01 : f32
    %201 = vector.broadcast %cst_92 : f32 to vector<8x1xf32>
    %202 = arith.divf %200, %201 : vector<8x1xf32>
    %203 = vector.broadcast %202 : vector<8x1xf32> to vector<8x32xf32>
    %204 = arith.subf %194, %203 : vector<8x32xf32>
    %205 = arith.mulf %204, %204 : vector<8x32xf32>
    %cst_93 = arith.constant dense<0.000000e+00> : vector<8xf32>
    %206 = vector.multi_reduction <add>, %205, %cst_93 [1] : vector<8x32xf32> to vector<8xf32>
    %207 = vector.shape_cast %206 : vector<8xf32> to vector<8x1xf32>
    %cst_94 = arith.constant 3.200000e+01 : f32
    %208 = vector.broadcast %cst_94 : f32 to vector<8x1xf32>
    %209 = arith.divf %207, %208 : vector<8x1xf32>
    %210 = vector.broadcast %202 : vector<8x1xf32> to vector<8x32xf32>
    %211 = arith.subf %194, %210 : vector<8x32xf32>
    %cst_95 = arith.constant 9.99999974E-6 : f32
    %212 = vector.broadcast %cst_95 : f32 to vector<8x1xf32>
    %213 = arith.addf %209, %212 : vector<8x1xf32>
    %214 = math.rsqrt %213 : vector<8x1xf32>
    %215 = vector.broadcast %214 : vector<8x1xf32> to vector<8x32xf32>
    %216 = arith.mulf %211, %215 : vector<8x32xf32>
    %217 = vector.broadcast %196 : vector<1x32xf32> to vector<8x32xf32>
    %218 = arith.mulf %217, %216 : vector<8x32xf32>
    %219 = vector.broadcast %198 : vector<1x32xf32> to vector<8x32xf32>
    %220 = arith.addf %218, %219 : vector<8x32xf32>
    %c1_96 = arith.constant 1 : index
    %c0_97 = arith.constant 0 : index
    %c0_98 = arith.constant 0 : index
    %221 = vector.load %arg6[%c1_96, %c0_97, %c0_98] : memref<2x32x96xf32, #tpu.memory_space<vmem>>, vector<1x32x96xf32>
    %222 = vector.shape_cast %221 : vector<1x32x96xf32> to vector<32x96xf32>
    %cst_99 = arith.constant dense<0.000000e+00> : vector<8x96xf32>
    %223 = tpu.matmul %220, %222, %cst_99 {dimension_numbers = #tpu.dot_dimension_numbers<[1], [0], [0], [1], [0, 0, 1, 1], [], []>} : vector<8x32xf32>, vector<32x96xf32>, vector<8x96xf32> -> vector<8x96xf32>
    %c1_100 = arith.constant 1 : index
    %c0_101 = arith.constant 0 : index
    %c0_102 = arith.constant 0 : index
    %224 = vector.load %arg7[%c1_100, %c0_101, %c0_102] : memref<2x1x96xf32, #tpu.memory_space<vmem>>, vector<1x1x96xf32>
    %225 = vector.shape_cast %224 : vector<1x1x96xf32> to vector<1x96xf32>
    %226 = vector.broadcast %225 : vector<1x96xf32> to vector<8x96xf32>
    %227 = arith.addf %223, %226 : vector<8x96xf32>
    %228 = vector.extract_strided_slice %227 {offsets = [0, 0], sizes = [8, 32], strides = [1, 1]} : vector<8x96xf32> to vector<8x32xf32>
    %229 = vector.extract_strided_slice %227 {offsets = [0, 32], sizes = [8, 32], strides = [1, 1]} : vector<8x96xf32> to vector<8x32xf32>
    %230 = vector.extract_strided_slice %227 {offsets = [0, 64], sizes = [8, 32], strides = [1, 1]} : vector<8x96xf32> to vector<8x32xf32>
    %231 = vector.extract_strided_slice %228 {offsets = [0, 0], sizes = [8, 8], strides = [1, 1]} : vector<8x32xf32> to vector<8x8xf32>
    %232 = vector.extract_strided_slice %229 {offsets = [0, 0], sizes = [8, 8], strides = [1, 1]} : vector<8x32xf32> to vector<8x8xf32>
    %233 = vector.extract_strided_slice %230 {offsets = [0, 0], sizes = [8, 8], strides = [1, 1]} : vector<8x32xf32> to vector<8x8xf32>
    %cst_103 = arith.constant dense<0.000000e+00> : vector<8x8xf32>
    %234 = tpu.matmul %231, %232, %cst_103 {dimension_numbers = #tpu.dot_dimension_numbers<[1], [1], [0], [0], [0, 0, 1, 0], [], []>} : vector<8x8xf32>, vector<8x8xf32>, vector<8x8xf32> -> vector<8x8xf32>
    %cst_104 = arith.constant 0.353553385 : f32
    %235 = vector.broadcast %cst_104 : f32 to vector<8x8xf32>
    %236 = arith.mulf %234, %235 : vector<8x8xf32>
    %cst_105 = arith.constant -1.000000e+10 : f32
    %237 = vector.broadcast %cst_105 : f32 to vector<8x8xf32>
    %238 = arith.select %19, %236, %237 : vector<8x8xi1>, vector<8x8xf32>
    %cst_106 = arith.constant dense<0xFF800000> : vector<8xf32>
    %239 = vector.multi_reduction <maximumf>, %238, %cst_106 [1] : vector<8x8xf32> to vector<8xf32>
    %240 = vector.shape_cast %239 : vector<8xf32> to vector<8x1xf32>
    %241 = vector.broadcast %240 : vector<8x1xf32> to vector<8x8xf32>
    %242 = arith.subf %238, %241 : vector<8x8xf32>
    %243 = math.exp %242 : vector<8x8xf32>
    %cst_107 = arith.constant dense<0.000000e+00> : vector<8xf32>
    %244 = vector.multi_reduction <add>, %243, %cst_107 [1] : vector<8x8xf32> to vector<8xf32>
    %245 = vector.shape_cast %244 : vector<8xf32> to vector<8x1xf32>
    %246 = tpu.reciprocal %245 {approx = true} : vector<8x1xf32> -> vector<8x1xf32>
    %247 = vector.broadcast %246 : vector<8x1xf32> to vector<8x8xf32>
    %248 = arith.mulf %243, %247 : vector<8x8xf32>
    %cst_108 = arith.constant dense<0.000000e+00> : vector<8x8xf32>
    %249 = tpu.matmul %248, %233, %cst_108 {dimension_numbers = #tpu.dot_dimension_numbers<[1], [0], [0], [1], [0, 0, 1, 1], [], []>} : vector<8x8xf32>, vector<8x8xf32>, vector<8x8xf32> -> vector<8x8xf32>
    %250 = vector.extract_strided_slice %228 {offsets = [0, 8], sizes = [8, 8], strides = [1, 1]} : vector<8x32xf32> to vector<8x8xf32>
    %251 = vector.extract_strided_slice %229 {offsets = [0, 8], sizes = [8, 8], strides = [1, 1]} : vector<8x32xf32> to vector<8x8xf32>
    %252 = vector.extract_strided_slice %230 {offsets = [0, 8], sizes = [8, 8], strides = [1, 1]} : vector<8x32xf32> to vector<8x8xf32>
    %cst_109 = arith.constant dense<0.000000e+00> : vector<8x8xf32>
    %253 = tpu.matmul %250, %251, %cst_109 {dimension_numbers = #tpu.dot_dimension_numbers<[1], [1], [0], [0], [0, 0, 1, 0], [], []>} : vector<8x8xf32>, vector<8x8xf32>, vector<8x8xf32> -> vector<8x8xf32>
    %cst_110 = arith.constant 0.353553385 : f32
    %254 = vector.broadcast %cst_110 : f32 to vector<8x8xf32>
    %255 = arith.mulf %253, %254 : vector<8x8xf32>
    %cst_111 = arith.constant -1.000000e+10 : f32
    %256 = vector.broadcast %cst_111 : f32 to vector<8x8xf32>
    %257 = arith.select %19, %255, %256 : vector<8x8xi1>, vector<8x8xf32>
    %cst_112 = arith.constant dense<0xFF800000> : vector<8xf32>
    %258 = vector.multi_reduction <maximumf>, %257, %cst_112 [1] : vector<8x8xf32> to vector<8xf32>
    %259 = vector.shape_cast %258 : vector<8xf32> to vector<8x1xf32>
    %260 = vector.broadcast %259 : vector<8x1xf32> to vector<8x8xf32>
    %261 = arith.subf %257, %260 : vector<8x8xf32>
    %262 = math.exp %261 : vector<8x8xf32>
    %cst_113 = arith.constant dense<0.000000e+00> : vector<8xf32>
    %263 = vector.multi_reduction <add>, %262, %cst_113 [1] : vector<8x8xf32> to vector<8xf32>
    %264 = vector.shape_cast %263 : vector<8xf32> to vector<8x1xf32>
    %265 = tpu.reciprocal %264 {approx = true} : vector<8x1xf32> -> vector<8x1xf32>
    %266 = vector.broadcast %265 : vector<8x1xf32> to vector<8x8xf32>
    %267 = arith.mulf %262, %266 : vector<8x8xf32>
    %cst_114 = arith.constant dense<0.000000e+00> : vector<8x8xf32>
    %268 = tpu.matmul %267, %252, %cst_114 {dimension_numbers = #tpu.dot_dimension_numbers<[1], [0], [0], [1], [0, 0, 1, 1], [], []>} : vector<8x8xf32>, vector<8x8xf32>, vector<8x8xf32> -> vector<8x8xf32>
    %269 = vector.extract_strided_slice %228 {offsets = [0, 16], sizes = [8, 8], strides = [1, 1]} : vector<8x32xf32> to vector<8x8xf32>
    %270 = vector.extract_strided_slice %229 {offsets = [0, 16], sizes = [8, 8], strides = [1, 1]} : vector<8x32xf32> to vector<8x8xf32>
    %271 = vector.extract_strided_slice %230 {offsets = [0, 16], sizes = [8, 8], strides = [1, 1]} : vector<8x32xf32> to vector<8x8xf32>
    %cst_115 = arith.constant dense<0.000000e+00> : vector<8x8xf32>
    %272 = tpu.matmul %269, %270, %cst_115 {dimension_numbers = #tpu.dot_dimension_numbers<[1], [1], [0], [0], [0, 0, 1, 0], [], []>} : vector<8x8xf32>, vector<8x8xf32>, vector<8x8xf32> -> vector<8x8xf32>
    %cst_116 = arith.constant 0.353553385 : f32
    %273 = vector.broadcast %cst_116 : f32 to vector<8x8xf32>
    %274 = arith.mulf %272, %273 : vector<8x8xf32>
    %cst_117 = arith.constant -1.000000e+10 : f32
    %275 = vector.broadcast %cst_117 : f32 to vector<8x8xf32>
    %276 = arith.select %19, %274, %275 : vector<8x8xi1>, vector<8x8xf32>
    %cst_118 = arith.constant dense<0xFF800000> : vector<8xf32>
    %277 = vector.multi_reduction <maximumf>, %276, %cst_118 [1] : vector<8x8xf32> to vector<8xf32>
    %278 = vector.shape_cast %277 : vector<8xf32> to vector<8x1xf32>
    %279 = vector.broadcast %278 : vector<8x1xf32> to vector<8x8xf32>
    %280 = arith.subf %276, %279 : vector<8x8xf32>
    %281 = math.exp %280 : vector<8x8xf32>
    %cst_119 = arith.constant dense<0.000000e+00> : vector<8xf32>
    %282 = vector.multi_reduction <add>, %281, %cst_119 [1] : vector<8x8xf32> to vector<8xf32>
    %283 = vector.shape_cast %282 : vector<8xf32> to vector<8x1xf32>
    %284 = tpu.reciprocal %283 {approx = true} : vector<8x1xf32> -> vector<8x1xf32>
    %285 = vector.broadcast %284 : vector<8x1xf32> to vector<8x8xf32>
    %286 = arith.mulf %281, %285 : vector<8x8xf32>
    %cst_120 = arith.constant dense<0.000000e+00> : vector<8x8xf32>
    %287 = tpu.matmul %286, %271, %cst_120 {dimension_numbers = #tpu.dot_dimension_numbers<[1], [0], [0], [1], [0, 0, 1, 1], [], []>} : vector<8x8xf32>, vector<8x8xf32>, vector<8x8xf32> -> vector<8x8xf32>
    %288 = vector.extract_strided_slice %228 {offsets = [0, 24], sizes = [8, 8], strides = [1, 1]} : vector<8x32xf32> to vector<8x8xf32>
    %289 = vector.extract_strided_slice %229 {offsets = [0, 24], sizes = [8, 8], strides = [1, 1]} : vector<8x32xf32> to vector<8x8xf32>
    %290 = vector.extract_strided_slice %230 {offsets = [0, 24], sizes = [8, 8], strides = [1, 1]} : vector<8x32xf32> to vector<8x8xf32>
    %cst_121 = arith.constant dense<0.000000e+00> : vector<8x8xf32>
    %291 = tpu.matmul %288, %289, %cst_121 {dimension_numbers = #tpu.dot_dimension_numbers<[1], [1], [0], [0], [0, 0, 1, 0], [], []>} : vector<8x8xf32>, vector<8x8xf32>, vector<8x8xf32> -> vector<8x8xf32>
    %cst_122 = arith.constant 0.353553385 : f32
    %292 = vector.broadcast %cst_122 : f32 to vector<8x8xf32>
    %293 = arith.mulf %291, %292 : vector<8x8xf32>
    %cst_123 = arith.constant -1.000000e+10 : f32
    %294 = vector.broadcast %cst_123 : f32 to vector<8x8xf32>
    %295 = arith.select %19, %293, %294 : vector<8x8xi1>, vector<8x8xf32>
    %cst_124 = arith.constant dense<0xFF800000> : vector<8xf32>
    %296 = vector.multi_reduction <maximumf>, %295, %cst_124 [1] : vector<8x8xf32> to vector<8xf32>
    %297 = vector.shape_cast %296 : vector<8xf32> to vector<8x1xf32>
    %298 = vector.broadcast %297 : vector<8x1xf32> to vector<8x8xf32>
    %299 = arith.subf %295, %298 : vector<8x8xf32>
    %300 = math.exp %299 : vector<8x8xf32>
    %cst_125 = arith.constant dense<0.000000e+00> : vector<8xf32>
    %301 = vector.multi_reduction <add>, %300, %cst_125 [1] : vector<8x8xf32> to vector<8xf32>
    %302 = vector.shape_cast %301 : vector<8xf32> to vector<8x1xf32>
    %303 = tpu.reciprocal %302 {approx = true} : vector<8x1xf32> -> vector<8x1xf32>
    %304 = vector.broadcast %303 : vector<8x1xf32> to vector<8x8xf32>
    %305 = arith.mulf %300, %304 : vector<8x8xf32>
    %cst_126 = arith.constant dense<0.000000e+00> : vector<8x8xf32>
    %306 = tpu.matmul %305, %290, %cst_126 {dimension_numbers = #tpu.dot_dimension_numbers<[1], [0], [0], [1], [0, 0, 1, 1], [], []>} : vector<8x8xf32>, vector<8x8xf32>, vector<8x8xf32> -> vector<8x8xf32>
    %307 = tpu.concatenate %249, %268, %287, %306 in 1 : vector<8x8xf32>, vector<8x8xf32>, vector<8x8xf32>, vector<8x8xf32> -> vector<8x32xf32>
    %c1_127 = arith.constant 1 : index
    %c0_128 = arith.constant 0 : index
    %c0_129 = arith.constant 0 : index
    %308 = vector.load %arg8[%c1_127, %c0_128, %c0_129] : memref<2x32x32xf32, #tpu.memory_space<vmem>>, vector<1x32x32xf32>
    %309 = vector.shape_cast %308 : vector<1x32x32xf32> to vector<32x32xf32>
    %cst_130 = arith.constant dense<0.000000e+00> : vector<8x32xf32>
    %310 = tpu.matmul %307, %309, %cst_130 {dimension_numbers = #tpu.dot_dimension_numbers<[1], [0], [0], [1], [0, 0, 1, 1], [], []>} : vector<8x32xf32>, vector<32x32xf32>, vector<8x32xf32> -> vector<8x32xf32>
    %c1_131 = arith.constant 1 : index
    %c0_132 = arith.constant 0 : index
    %c0_133 = arith.constant 0 : index
    %311 = vector.load %arg9[%c1_131, %c0_132, %c0_133] : memref<2x1x32xf32, #tpu.memory_space<vmem>>, vector<1x1x32xf32>
    %312 = vector.shape_cast %311 : vector<1x1x32xf32> to vector<1x32xf32>
    %313 = vector.broadcast %312 : vector<1x32xf32> to vector<8x32xf32>
    %314 = arith.addf %310, %313 : vector<8x32xf32>
    %315 = arith.addf %194, %314 : vector<8x32xf32>
    %c1_134 = arith.constant 1 : index
    %c0_135 = arith.constant 0 : index
    %c0_136 = arith.constant 0 : index
    %316 = vector.load %arg10[%c1_134, %c0_135, %c0_136] : memref<2x1x32xf32, #tpu.memory_space<vmem>>, vector<1x1x32xf32>
    %317 = vector.shape_cast %316 : vector<1x1x32xf32> to vector<1x32xf32>
    %c1_137 = arith.constant 1 : index
    %c0_138 = arith.constant 0 : index
    %c0_139 = arith.constant 0 : index
    %318 = vector.load %arg11[%c1_137, %c0_138, %c0_139] : memref<2x1x32xf32, #tpu.memory_space<vmem>>, vector<1x1x32xf32>
    %319 = vector.shape_cast %318 : vector<1x1x32xf32> to vector<1x32xf32>
    %cst_140 = arith.constant dense<0.000000e+00> : vector<8xf32>
    %320 = vector.multi_reduction <add>, %315, %cst_140 [1] : vector<8x32xf32> to vector<8xf32>
    %321 = vector.shape_cast %320 : vector<8xf32> to vector<8x1xf32>
    %cst_141 = arith.constant 3.200000e+01 : f32
    %322 = vector.broadcast %cst_141 : f32 to vector<8x1xf32>
    %323 = arith.divf %321, %322 : vector<8x1xf32>
    %324 = vector.broadcast %323 : vector<8x1xf32> to vector<8x32xf32>
    %325 = arith.subf %315, %324 : vector<8x32xf32>
    %326 = arith.mulf %325, %325 : vector<8x32xf32>
    %cst_142 = arith.constant dense<0.000000e+00> : vector<8xf32>
    %327 = vector.multi_reduction <add>, %326, %cst_142 [1] : vector<8x32xf32> to vector<8xf32>
    %328 = vector.shape_cast %327 : vector<8xf32> to vector<8x1xf32>
    %cst_143 = arith.constant 3.200000e+01 : f32
    %329 = vector.broadcast %cst_143 : f32 to vector<8x1xf32>
    %330 = arith.divf %328, %329 : vector<8x1xf32>
    %331 = vector.broadcast %323 : vector<8x1xf32> to vector<8x32xf32>
    %332 = arith.subf %315, %331 : vector<8x32xf32>
    %cst_144 = arith.constant 9.99999974E-6 : f32
    %333 = vector.broadcast %cst_144 : f32 to vector<8x1xf32>
    %334 = arith.addf %330, %333 : vector<8x1xf32>
    %335 = math.rsqrt %334 : vector<8x1xf32>
    %336 = vector.broadcast %335 : vector<8x1xf32> to vector<8x32xf32>
    %337 = arith.mulf %332, %336 : vector<8x32xf32>
    %338 = vector.broadcast %317 : vector<1x32xf32> to vector<8x32xf32>
    %339 = arith.mulf %338, %337 : vector<8x32xf32>
    %340 = vector.broadcast %319 : vector<1x32xf32> to vector<8x32xf32>
    %341 = arith.addf %339, %340 : vector<8x32xf32>
    %c1_145 = arith.constant 1 : index
    %c0_146 = arith.constant 0 : index
    %c0_147 = arith.constant 0 : index
    %342 = vector.load %arg12[%c1_145, %c0_146, %c0_147] : memref<2x32x128xf32, #tpu.memory_space<vmem>>, vector<1x32x128xf32>
    %343 = vector.shape_cast %342 : vector<1x32x128xf32> to vector<32x128xf32>
    %cst_148 = arith.constant dense<0.000000e+00> : vector<8x128xf32>
    %344 = tpu.matmul %341, %343, %cst_148 {dimension_numbers = #tpu.dot_dimension_numbers<[1], [0], [0], [1], [0, 0, 1, 1], [], []>} : vector<8x32xf32>, vector<32x128xf32>, vector<8x128xf32> -> vector<8x128xf32>
    %c1_149 = arith.constant 1 : index
    %c0_150 = arith.constant 0 : index
    %c0_151 = arith.constant 0 : index
    %345 = vector.load %arg13[%c1_149, %c0_150, %c0_151] : memref<2x1x128xf32, #tpu.memory_space<vmem>>, vector<1x1x128xf32>
    %346 = vector.shape_cast %345 : vector<1x1x128xf32> to vector<1x128xf32>
    %347 = vector.broadcast %346 : vector<1x128xf32> to vector<8x128xf32>
    %348 = arith.addf %344, %347 : vector<8x128xf32>
    %cst_152 = arith.constant 5.000000e-01 : f32
    %349 = vector.broadcast %cst_152 : f32 to vector<8x128xf32>
    %350 = arith.mulf %349, %348 : vector<8x128xf32>
    %351 = arith.mulf %348, %348 : vector<8x128xf32>
    %352 = arith.mulf %348, %351 : vector<8x128xf32>
    %cst_153 = arith.constant 4.471500e-02 : f32
    %353 = vector.broadcast %cst_153 : f32 to vector<8x128xf32>
    %354 = arith.mulf %353, %352 : vector<8x128xf32>
    %355 = arith.addf %348, %354 : vector<8x128xf32>
    %cst_154 = arith.constant 0.797884583 : f32
    %356 = vector.broadcast %cst_154 : f32 to vector<8x128xf32>
    %357 = arith.mulf %356, %355 : vector<8x128xf32>
    %358 = math.tanh %357 : vector<8x128xf32>
    %cst_155 = arith.constant 1.000000e+00 : f32
    %359 = vector.broadcast %cst_155 : f32 to vector<8x128xf32>
    %360 = arith.addf %359, %358 : vector<8x128xf32>
    %361 = arith.mulf %350, %360 : vector<8x128xf32>
    %c1_156 = arith.constant 1 : index
    %c0_157 = arith.constant 0 : index
    %c0_158 = arith.constant 0 : index
    %362 = vector.load %arg14[%c1_156, %c0_157, %c0_158] : memref<2x128x32xf32, #tpu.memory_space<vmem>>, vector<1x128x32xf32>
    %363 = vector.shape_cast %362 : vector<1x128x32xf32> to vector<128x32xf32>
    %cst_159 = arith.constant dense<0.000000e+00> : vector<8x32xf32>
    %364 = tpu.matmul %361, %363, %cst_159 {dimension_numbers = #tpu.dot_dimension_numbers<[1], [0], [0], [1], [0, 0, 1, 1], [], []>} : vector<8x128xf32>, vector<128x32xf32>, vector<8x32xf32> -> vector<8x32xf32>
    %c1_160 = arith.constant 1 : index
    %c0_161 = arith.constant 0 : index
    %c0_162 = arith.constant 0 : index
    %365 = vector.load %arg15[%c1_160, %c0_161, %c0_162] : memref<2x1x32xf32, #tpu.memory_space<vmem>>, vector<1x1x32xf32>
    %366 = vector.shape_cast %365 : vector<1x1x32xf32> to vector<1x32xf32>
    %367 = vector.broadcast %366 : vector<1x32xf32> to vector<8x32xf32>
    %368 = arith.addf %364, %367 : vector<8x32xf32>
    %369 = arith.addf %315, %368 : vector<8x32xf32>
    %370 = tpu.concatenate %54, %55, %229, %230 in 1 : vector<8x32xf32>, vector<8x32xf32>, vector<8x32xf32>, vector<8x32xf32> -> vector<8x128xf32>
    %c0_163 = arith.constant 0 : index
    %c0_164 = arith.constant 0 : index
    %371 = vector.load %arg19[%c0_163, %c0_164] : memref<8x128xf32, #tpu.memory_space<vmem>>, vector<8x128xf32>
    tpu.vector_store %arg19[%c0_163, %c0_164], %370 {strides = array<i32>} : memref<8x128xf32, #tpu.memory_space<vmem>>, vector<8x128xf32>,
    %c0_165 = arith.constant 0 : index
    %c0_166 = arith.constant 0 : index
    %372 = vector.load %arg16[%c0_165, %c0_166] : memref<1x32xf32, #tpu.memory_space<vmem>>, vector<1x32xf32>
    %c0_167 = arith.constant 0 : index
    %c0_168 = arith.constant 0 : index
    %373 = vector.load %arg17[%c0_167, %c0_168] : memref<1x32xf32, #tpu.memory_space<vmem>>, vector<1x32xf32>
    %cst_169 = arith.constant dense<0.000000e+00> : vector<8xf32>
    %374 = vector.multi_reduction <add>, %369, %cst_169 [1] : vector<8x32xf32> to vector<8xf32>
    %375 = vector.shape_cast %374 : vector<8xf32> to vector<8x1xf32>
    %cst_170 = arith.constant 3.200000e+01 : f32
    %376 = vector.broadcast %cst_170 : f32 to vector<8x1xf32>
    %377 = arith.divf %375, %376 : vector<8x1xf32>
    %378 = vector.broadcast %377 : vector<8x1xf32> to vector<8x32xf32>
    %379 = arith.subf %369, %378 : vector<8x32xf32>
    %380 = arith.mulf %379, %379 : vector<8x32xf32>
    %cst_171 = arith.constant dense<0.000000e+00> : vector<8xf32>
    %381 = vector.multi_reduction <add>, %380, %cst_171 [1] : vector<8x32xf32> to vector<8xf32>
    %382 = vector.shape_cast %381 : vector<8xf32> to vector<8x1xf32>
    %cst_172 = arith.constant 3.200000e+01 : f32
    %383 = vector.broadcast %cst_172 : f32 to vector<8x1xf32>
    %384 = arith.divf %382, %383 : vector<8x1xf32>
    %385 = vector.broadcast %377 : vector<8x1xf32> to vector<8x32xf32>
    %386 = arith.subf %369, %385 : vector<8x32xf32>
    %cst_173 = arith.constant 9.99999974E-6 : f32
    %387 = vector.broadcast %cst_173 : f32 to vector<8x1xf32>
    %388 = arith.addf %384, %387 : vector<8x1xf32>
    %389 = math.rsqrt %388 : vector<8x1xf32>
    %390 = vector.broadcast %389 : vector<8x1xf32> to vector<8x32xf32>
    %391 = arith.mulf %386, %390 : vector<8x32xf32>
    %392 = vector.broadcast %372 : vector<1x32xf32> to vector<8x32xf32>
    %393 = arith.mulf %392, %391 : vector<8x32xf32>
    %394 = vector.broadcast %373 : vector<1x32xf32> to vector<8x32xf32>
    %395 = arith.addf %393, %394 : vector<8x32xf32>
    %c0_174 = arith.constant 0 : index
    %c0_175 = arith.constant 0 : index
    %396 = vector.load %arg2[%c0_174, %c0_175] : memref<256x32xf32, #tpu.memory_space<vmem>>, vector<256x32xf32>
    %cst_176 = arith.constant dense<0.000000e+00> : vector<8x256xf32>
    %397 = tpu.matmul %395, %396, %cst_176 {dimension_numbers = #tpu.dot_dimension_numbers<[1], [1], [0], [0], [0, 0, 1, 0], [], []>} : vector<8x32xf32>, vector<256x32xf32>, vector<8x256xf32> -> vector<8x256xf32>
    %c0_177 = arith.constant 0 : index
    %c0_178 = arith.constant 0 : index
    %398 = vector.load %arg18[%c0_177, %c0_178] : memref<8x256xf32, #tpu.memory_space<vmem>>, vector<8x256xf32>
    tpu.vector_store %arg18[%c0_177, %c0_178], %397 {strides = array<i32>} : memref<8x256xf32, #tpu.memory_space<vmem>>, vector<8x256xf32>,
    return
  }
}

</mosaic_0001>

<bundles_post_ra>
// kernel: squeeze.5
= control target key start
LH: loop header
LB: loop body
LE: loop exit
PB: predicated region body
PF: predicated region fallthrough
CT: control target
= control target key end

     0   :  { %vm3_vm0 = vcmask 64512   ;;  %s94_s8 = smov 104   ;;  %s95_s9 = smov 112   ;;  %s141_s0 = inlined_call_operand.vmem [shape: f32[8,1,1,32], index: 0, kind: input, shape index: {}]   ;;  %s142_s1 = inlined_call_operand.vmem [shape: f32[8,4,8], index: 1, kind: output, shape index: {}]  }
   0x1   :  { %v6_v0 = vld [vmem:[%s141_s0] sm:$0xff]   ;;  %s93_s0 = smov 120  }
   0x2   :  { %7 = vrot.lane.b32.xlu0 %v6_v0, %s93_s0  ;;  %23 = vrot.lane.b32.xlu1 %v6_v0, %s94_s8  ;;  %5 = vst.msk [vmem:[#allocation0] ss:$8 sm:$0xf0] %vm3_vm0, %v6_v0   ;;  %4 = vst.msk [vmem:[#allocation0] ss:$8 sm:$0xf] %vm3_vm0, %v6_v0  }
   0x6   :  { %15 = vrot.lane.b32.xlu0 %v6_v0, %s95_s9 }
  0x74   :  { %v8_v1 = vpop.permute.xlu0 %7   ;;  %v24_v2 = vpop.permute.xlu1 %23  }
  0x75   :  { %11 = vst.msk [vmem:[#allocation0 + $0x1] ss:$8 sm:$0xf] %vm3_vm0, %v8_v1   ;;  %13 = vst.msk [vmem:[#allocation0 + $0x1] ss:$8 sm:$0xf0] %vm3_vm0, %v8_v1  }
  0x76   :  { %27 = vst.msk [vmem:[#allocation0 + $0x3] ss:$8 sm:$0xf] %vm3_vm0, %v24_v2   ;;  %29 = vst.msk [vmem:[#allocation0 + $0x3] ss:$8 sm:$0xf0] %vm3_vm0, %v24_v2  }
  0x78   :  { %v16_v3 = vpop.permute.xlu0 %15  }
  0x79   :  { %19 = vst.msk [vmem:[#allocation0 + $0x2] ss:$8 sm:$0xf] %vm3_vm0, %v16_v3   ;;  %21 = vst.msk [vmem:[#allocation0 + $0x2] ss:$8 sm:$0xf0] %vm3_vm0, %v16_v3  }
  0x80   :  { %v33_v4 = vld [vmem:[#allocation0] sm:$0xf]  ;;  %v37_v5 = vld [vmem:[#allocation0 + $0x8] sm:$0xf]  ;;  %v42_v6 = vld [vmem:[#allocation0 + $0x10] sm:$0xf] }
  0x81   :  { %35 = vst [vmem:[%s142_s1] sm:$0xf] %v33_v4  ;;  %83 = vst [vmem:[%s142_s1 + $0x4] sm:$0xf] %v37_v5  ;;  %v48_v7 = vld [vmem:[#allocation0 + $0x18] sm:$0xf] }
  0x82   :  { %84 = vst [vmem:[%s142_s1 + $0x8] sm:$0xf] %v42_v6  ;;  %v54_v8 = vld [vmem:[#allocation0 + $0x20] sm:$0xf]  ;;  %v60_v9 = vld [vmem:[#allocation0 + $0x28] sm:$0xf] }
  0x83   :  { %85 = vst [vmem:[%s142_s1 + $0xc] sm:$0xf] %v48_v7  ;;  %86 = vst [vmem:[%s142_s1 + $0x10] sm:$0xf] %v54_v8  ;;  %v66_v10 = vld [vmem:[#allocation0 + $0x30] sm:$0xf] }
  0x84   :  { %87 = vst [vmem:[%s142_s1 + $0x14] sm:$0xf] %v60_v9  ;;  %v72_v11 = vld [vmem:[#allocation0 + $0x38] sm:$0xf]  ;;  %88 = vst [vmem:[%s142_s1 + $0x18] sm:$0xf] %v66_v10 }
  0x85   :  { %89 = vst [vmem:[%s142_s1 + $0x1c] sm:$0xf] %v72_v11 }

// kernel: gpt2_forward.1
= control target key start
LH: loop header
LB: loop body
LE: loop exit
PB: predicated region body
PF: predicated region fallthrough
CT: control target
= control target key end

     0   :  { %s4398_s0 = inlined_call_operand.vmem [shape: s32[8,1], index: 0, kind: input, shape index: {}]   ;;  %s4399_s1 = inlined_call_operand.vmem [shape: s32[8,1], index: 1, kind: input, shape index: {}]   ;;  %s4400_s2 = inlined_call_operand.vmem [shape: f32[256,32], index: 2, kind: input, shape index: {}]   ;;  %s4401_s3 = inlined_call_operand.vmem [shape: f32[32,32], index: 3, kind: input, shape index: {}]   ;;  %s4402_s4 = inlined_call_operand.vmem [shape: f32[2,1,32], index: 4, kind: input, shape index: {}]   ;;  %s4403_s5 = inlined_call_operand.vmem [shape: f32[2,1,32], index: 5, kind: input, shape index: {}]   ;;  %s4404_s6 = inlined_call_operand.vmem [shape: f32[2,32,96], index: 6, kind: input, shape index: {}]   ;;  %s4405_s7 = inlined_call_operand.vmem [shape: f32[2,1,96], index: 7, kind: input, shape index: {}]   ;;  %s4406_s8 = inlined_call_operand.vmem [shape: f32[2,32,32], index: 8, kind: input, shape index: {}]   ;;  %s4407_s9 = inlined_call_operand.vmem [shape: f32[2,1,32], index: 9, kind: input, shape index: {}]   ;;  %s4408_s10 = inlined_call_operand.vmem [shape: f32[2,1,32], index: 10, kind: input, shape index: {}]   ;;  %s4409_s11 = inlined_call_operand.vmem [shape: f32[2,1,32], index: 11, kind: input, shape index: {}]   ;;  %s4410_s12 = inlined_call_operand.vmem [shape: f32[2,32,128], index: 12, kind: input, shape index: {}]   ;;  %s4411_s13 = inlined_call_operand.vmem [shape: f32[2,1,128], index: 13, kind: input, shape index: {}]   ;;  %s4412_s14 = inlined_call_operand.vmem [shape: f32[2,128,32], index: 14, kind: input, shape index: {}]   ;;  %s4413_s15 = inlined_call_operand.vmem [shape: f32[2,1,32], index: 15, kind: input, shape index: {}]   ;;  %s4414_s16 = inlined_call_operand.vmem [shape: f32[1,32], index: 16, kind: input, shape index: {}]   ;;  %s4415_s17 = inlined_call_operand.vmem [shape: f32[1,32], index: 17, kind: input, shape index: {}]   ;;  %s4416_s18 = inlined_call_operand.hbm [shape: f32[8,256], index: 18, kind: output, shape index: {0}]   ;;  %s4417_s19 = inlined_call_operand.vmem [shape: f32[8,128], index: 19, kind: output, shape index: {1}]  }
   0x1   :  { %4429 = sst [smem:[#allocation5_spill]] %s4398_s0 }
   0x2   :  { %4430 = sst [smem:[#allocation6_spill]] %s4399_s1 }
   0x3   :  { %4431 = sst [smem:[#allocation7_spill]] %s4400_s2 }
   0x4   :  { %4432 = sst [smem:[#allocation8_spill]] %s4401_s3 }
   0x5   :  { %4433 = sst [smem:[#allocation9_spill]] %s4411_s13 }
   0x6   :  { %s4434_s20 = sld [smem:[#allocation5_spill]]  ;;  %s4435_s13 = sld [smem:[#allocation7_spill]]  ;;  %v3515_v2 = vmov 0   ;;  %v3516_v7 = vmov 0.0|0.0   ;;  %vm3517_vm0 = vmmov 0   ;;  %v3518_v23 = vmov 0.0  }
   0x7   :  { %3444 = vset.pattern.permute.xlu0 %v3515_v2  ;;  %s4436_s23 = sld [smem:[#allocation6_spill]]  ;;  %3253 = vmatprep.subr.bf16.mxu0 %v3516_v7  ;;  %s4437_s3 = sld [smem:[#allocation8_spill]] }
   0x8   :  { %3034 = vmatprep.mubr.msk.f32.mxu0 %vm3517_vm0, %v3518_v23 }
   0xc   :  { %v62_v0 = vld [vmem:[%s4434_s20] sm:$0xff]  ;;  %v99_v4 = vld [vmem:[%s4435_s13 + $0x88] sm:$0xff]  ;;  %v100_v10 = vld [vmem:[%s4435_s13 + $0x90] sm:$0xff] }
   0xd   :  { %v98_v1 = vld [vmem:[%s4435_s13 + $0x80] sm:$0xff]  ;;  %v83_v6 = vld [vmem:[%s4435_s13 + $0x8] sm:$0xff]  ;;  %68 = vperm.xlu0 %3444, %v62_v0   ;;  %v101_v11 = vld [vmem:[%s4435_s13 + $0x98] sm:$0xff] }
   0xe   :  { %v63_v3 = vld [vmem:[%s4436_s23] sm:$0xff]  ;;  %v3259_v8 = vpack.c.bf16 %v99_v4, %v98_v1  ;;  %v84_v12 = vld [vmem:[%s4435_s13 + $0x10] sm:$0xff]  ;;  %v3263_v13 = vpack.c.bf16 %v101_v11, %v100_v10  ;;  %v85_v14 = vld [vmem:[%s4435_s13 + $0x18] sm:$0xff] }
   0xf   :  { %v82_v5 = vld [vmem:[%s4435_s13] sm:$0xff]  ;;  %v103_v16 = vld [vmem:[%s4435_s13 + $0xa8] sm:$0xff]  ;;  %v3265_v17 = vpack.c.bf16 %v85_v14, %v84_v12  ;;  %v104_v21 = vld [vmem:[%s4435_s13 + $0xb0] sm:$0xff] }
  0x10   :  { %v3261_v9 = vpack.c.bf16 %v83_v6, %v82_v5  ;;  %v102_v15 = vld [vmem:[%s4435_s13 + $0xa0] sm:$0xff]  ;;  %3260 = vmatprep.subr.bf16.mxu1 %v3259_v8  ;;  %v87_v20 = vld [vmem:[%s4435_s13 + $0x28] sm:$0xff]  ;;  %v105_v22 = vld [vmem:[%s4435_s13 + $0xb8] sm:$0xff] }
  0x11   :  { %77 = vperm.xlu0 %3444, %v63_v3   ;;  %v3267_v18 = vpack.c.bf16 %v103_v16, %v102_v15  ;;  %v86_v19 = vld [vmem:[%s4435_s13 + $0x20] sm:$0xff]  ;;  %v3271_v25 = vpack.c.bf16 %v105_v22, %v104_v21  ;;  %v88_v26 = vld [vmem:[%s4435_s13 + $0x30] sm:$0xff]  ;;  %v89_v27 = vld [vmem:[%s4435_s13 + $0x38] sm:$0xff] }
  0x12   :  { %3262 = vmatpush3.bf16.msra.mxu1 %v3261_v9  ;;  %v3269_v24 = vpack.c.bf16 %v87_v20, %v86_v19  ;;  %v114_v28 = vld [vmem:[%s4437_s3] sm:$0xff]  ;;  %v107_v30 = vld [vmem:[%s4435_s13 + $0xc8] sm:$0xff]  ;;  %v116_v33 = vld [vmem:[%s4437_s3 + $0x10] sm:$0xff] }
  0x13   :  { %3264 = vmatprep.subr.bf16.mxu1 %v3263_v13  ;;  %v106_v29 = vld [vmem:[%s4435_s13 + $0xc0] sm:$0xff]  ;;  %v115_v31 = vld [vmem:[%s4437_s3 + $0x8] sm:$0xff]  ;;  %v117_v34 = vld [vmem:[%s4437_s3 + $0x18] sm:$0xff] }
  0x14   :  { %v3254_v32 = vpack.c.bf16 %v115_v31, %v114_v28 }
  0x16   :  { %3266 = vmatpush3.bf16.msra.mxu1 %v3265_v17 }
  0x17   :  { %3268 = vmatprep.subr.bf16.mxu1 %v3267_v18 }
  0x18   :  { %25 = vsyncpa [#allocation3], 0  ;;  %v3273_v35 = vpack.c.bf16 %v89_v27, %v88_v26  ;;  %v3275_v36 = vpack.c.bf16 %v107_v30, %v106_v29  ;;  %v90_v37 = vld [vmem:[%s4435_s13 + $0x40] sm:$0xff]  ;;  %v91_v38 = vld [vmem:[%s4435_s13 + $0x48] sm:$0xff]  ;;  %3255 = vmatpush3.bf16.msra.mxu0 %v3254_v32  ;;  %v3257_v39 = vpack.c.bf16 %v117_v34, %v116_v33  ;;  %v64_v59 = vlaneseq  ;;  %s3520_s21 = smov 96   ;;  %s3521_s1 = smov 64  }
  0x19   :  { %v108_v40 = vld [vmem:[%s4435_s13 + $0xd0] sm:$0xff]  ;;  %v109_v41 = vld [vmem:[%s4435_s13 + $0xd8] sm:$0xff]  ;;  %3256 = vmatprep.subr.bf16.mxu0 %v3516_v7  ;;  %v3277_v42 = vpack.c.bf16 %v91_v38, %v90_v37  ;;  %v110_v46 = vld [vmem:[%s4435_s13 + $0xe0] sm:$0xff]  ;;  %v3519_v63 = vmov 1.0   ;;  %vm118_vm3 = vcmask 261120   ;;  %vm382_vm5 = vcmask 64512  }
  0x1a   :  { %3270 = vmatpush3.bf16.msra.mxu1 %v3269_v24  ;;  %v3279_v43 = vpack.c.bf16 %v109_v41, %v108_v40  ;;  %v92_v44 = vld [vmem:[%s4435_s13 + $0x50] sm:$0xff]  ;;  %v93_v45 = vld [vmem:[%s4435_s13 + $0x58] sm:$0xff]  ;;  %v111_v47 = vld [vmem:[%s4435_s13 + $0xe8] sm:$0xff]  ;;  %v3757_v60 = vand.u32 127, %v64_v59  ;;  %s3522_s22 = smov 88   ;;  %s3523_s2 = smov 120  }
  0x1b   :  { %3272 = vmatprep.subr.bf16.mxu1 %v3271_v25  ;;  %v3281_v48 = vpack.c.bf16 %v93_v45, %v92_v44  ;;  %v3283_v49 = vpack.c.bf16 %v111_v47, %v110_v46  ;;  %v94_v50 = vld [vmem:[%s4435_s13 + $0x60] sm:$0xff]  ;;  %v95_v51 = vld [vmem:[%s4435_s13 + $0x68] sm:$0xff]  ;;  %v112_v52 = vld [vmem:[%s4435_s13 + $0xf0] sm:$0xff]  ;;  %s4425_s23 = smov 56   ;;  %s3525_s24 = smov 80   ;;  %vm1060_vm7 = vcmask 130048  }
  0x1c   :  { %3258 = vmatpush3.bf16.msra.mxu0 %v3257_v39  ;;  %v113_v53 = vld [vmem:[%s4435_s13 + $0xf8] sm:$0xff]  ;;  %v3285_v54 = vpack.c.bf16 %v95_v51, %v94_v50  ;;  %v96_v56 = vld [vmem:[%s4435_s13 + $0x70] sm:$0xff]  ;;  %v66_v61 = vadd.s32 128, %v3757_v60  ;;  %v295_v15 = vld [vmem:[%s4404_s6] sm:$0xff]  ;;  %s4424_s25 = smov 72   ;;  %s3527_s26 = smov 112  }
  0x1d   :  { %3291 = vmatprep.subr.bf16.mxu0 %v3516_v7  ;;  %v3287_v55 = vpack.c.bf16 %v113_v53, %v112_v52  ;;  %v97_v57 = vld [vmem:[%s4435_s13 + $0x78] sm:$0xff]  ;;  %v296_v16 = vld [vmem:[%s4404_s6 + $0x8] sm:$0xff]  ;;  %v297_v18 = vld [vmem:[%s4404_s6 + $0x10] sm:$0xff]  ;;  %s4428_s27 = smov 104   ;;  %s4421_s3 = smov 40   ;;  %vm1062_vm8 = vcmask 195584  }
  0x1e   :  { %3274 = vmatpush3.bf16.msra.mxu1 %v3273_v35  ;;  %v3289_v58 = vpack.c.bf16 %v97_v57, %v96_v56  ;;  %v3292_v17 = vpack.c.bf16 %v296_v16, %v295_v15  ;;  %v298_v19 = vld [vmem:[%s4404_s6 + $0x18] sm:$0xff]  ;;  %v2739_v26 = vld [vmem:[%s4402_s4] ss:$0 sm:$0xff]  ;;  %s4423_s28 = smov 48   ;;  %s4422_s29 = smov 8   ;;  %vm4246_vm9 = vmpackc.low %vm118_vm3, %vm118_vm3  ;;  %vm2477_vm10 = vcmask 523264  }
  0x1f   :  { %3276 = vmatprep.subr.bf16.mxu1 %v3275_v36  ;;  %v3295_v20 = vpack.c.bf16 %v298_v19, %v297_v18  ;;  %v2740_v28 = vld [vmem:[%s4403_s5] ss:$0 sm:$0xff]  ;;  %v263_v36 = vshrl.u32 %v64_v59, 7  ;;  %s4427_s0 = smov 16   ;;  %vm2479_vm11 = vcmask 785408  }
  0x20   :  { %v2741_v31 = vld [vmem:[%s4405_s7] ss:$0 sm:$0xff] }
  0x21   :  { %vm3815_vm6 = vcmp.ge.s32.totalorder %v263_v36, %v3757_v60 }
  0x22   :  { %3278 = vmatpush3.bf16.msra.mxu1 %v3277_v42 }
  0x23   :  { %3280 = vmatprep.subr.bf16.mxu1 %v3279_v43 }
  0x26   :  { %3282 = vmatpush3.bf16.msra.mxu1 %v3281_v48 }
  0x27   :  { %3284 = vmatprep.subr.bf16.mxu1 %v3283_v49 }
  0x2a   :  { %3286 = vmatpush3.bf16.msra.mxu1 %v3285_v54 }
  0x2b   :  { %3288 = vmatprep.subr.bf16.mxu1 %v3287_v55 }
  0x2e   :  { %3290 = vmatpush3.bf16.msra.mxu1 %v3289_v58 }
  0x2f   :  { %3073 = vmatprep.subr.mxu1 %v3518_v23 }
  0x8c   :  { %v69_v62 = vpop.permute.xlu0 %68 }
  0x8d   :  { %vm70_vm1 = vcmp.eq.s32.totalorder %v69_v62, %v3757_v60  ;;  %vm71_vm2 = vcmp.eq.s32.totalorder %v69_v62, %v66_v61 }
  0x8e   :  { %2737 = vmatprep.mubr.msk.f32.mxu1 %vm71_vm2, %v3519_v63 }
  0x8f   :  { %2738 = vmatmul.mubr.msk.f32.vlgmr.msra.gmra.mrb[0].mxu1 %vm70_vm1, %v3519_v63 }
  0x90   :  { %v78_v0 = vpop.permute.xlu0 %77  ;;  %3075 = vmatprep.mubr.msk.f32.mxu1 %vm3517_vm0, %v3518_v23 }
  0x91   :  { %vm79_vm4 = vcmp.eq.s32.totalorder %v78_v0, %v3757_v60 }
  0x92   :  { %v2735_v1 = vsel %vm79_vm4, 1.0, %v3518_v23 }
  0x93   :  { %3035 = vmatmul.mubr.msk.f32.vlgmr.msra.gmra.mrb[0].mxu0 %vm118_vm3, %v2735_v1 }
  0x94   :  { %3045 = vmatprep.mubr.msk.f32.mxu0 %vm3517_vm0, %v3518_v23  ;;  %3293 = vmatpush3.bf16.msra.mxu0 %v3292_v17 }
  0x95   :  { %3294 = vmatprep.subr.bf16.mxu0 %v3516_v7 }
  0x98   :  { %3296 = vmatpush3.bf16.msra.mxu0 %v3295_v20 }
  0x99   :  { %3048 = vmatprep.subr.mxu0 %v3518_v23 }
 0x162   :  { %v2893_v2 = vpop.f32.mrb[0].mxu1 }
 0x163   :  { %v2894_v3 = vpop.f32.mrb[1].mxu1 }
 0x164   :  { %v2895_v4 = vadd.f32 %v2894_v3, %v2893_v2 }
 0x166   :  { %v188_v5 = vpop.f32.mrb[0].mxu0 }
 0x167   :  { %v3768_v6 = vadd.f32 %v2895_v4, %v188_v5  ;;  %v3036_v8 = vpop.f32.mrb[1].mxu0 }
 0x169   :  { %v267_v9 = vsel %vm118_vm3, %v3768_v6, 0.0 }
 0x16a   :  { %268 = vadd.xlane.f32.xlu1 %v267_v9 }
 0x1f7   :  { %v269_v10 = vpop.xlane.xlu1 %268 }
 0x1f8   :  { %v271_v11 = vmul.f32 0.03125, %v269_v10 }
 0x1fa   :  { %v272_v12 = vsub.f32 %v3768_v6, %v271_v11 }
 0x1fc   :  { %v273_v13 = vmul.f32 %v272_v12, %v272_v12 }
 0x1fe   :  { %v274_v14 = vsel %vm118_vm3, %v273_v13, 0.0 }
 0x1ff   :  { %275 = vadd.xlane.f32.xlu1 %v274_v14 }
 0x28c   :  { %v276_v21 = vpop.xlane.xlu1 %275 }
 0x28d   :  { %v277_v22 = vmul.f32 0.03125, %v276_v21 }
 0x28f   :  { %v278_v24 = vadd.f32 1e-05, %v277_v22 }
 0x291   :  { %3445 = vrsqrt.f32 %v278_v24 }
 0x29b   :  { %v3446_v25 = vpop.eup %3445 }
 0x29c   :  { %v280_v27 = vmul.f32 %v3446_v25, %v272_v12 }
 0x29e   :  { %v287_v29 = vmul.f32 %v2739_v26, %v280_v27 }
 0x2a0   :  { %v294_v30 = vadd.f32 %v2740_v28, %v287_v29 }
 0x2a2   :  { %3046 = vmatmul.mubr.msk.f32.vlgmr.msra.gmra.mrb[2].mxu0 %vm118_vm3, %v294_v30 }
 0x2a3   :  { %3050 = vmatprep.mubr.msk.f32.mxu0 %vm3517_vm0, %v3518_v23 }
 0x375   :  { %v375_v32 = vpop.f32.mrb[2].mxu0 }
 0x376   :  { %v3800_v33 = vadd.f32 %v2741_v31, %v375_v32  ;;  %v3047_v34 = vpop.f32.mrb[3].mxu0 }
 0x378   :  { %380 = vrot.lane.b32.xlu0 %v3800_v33, %s3520_s21 }
 0x3ea   :  { %v3804_v35 = vpop.permute.xlu0 %380 }
 0x3eb   :  { %3049 = vmatpush3.xpose.msk.msra.mxu0 %vm382_vm5, %v3804_v35 }
 0x3ec   :  { %3053 = vmatprep.subr.mxu0 %v3518_v23 }
 0x3ee   :  { %3051 = vmatmul.mubr.msk.f32.vlgmr.msra.gmra.mrb[4].mxu0 %vm382_vm5, %v3800_v33 }
 0x3ef   :  { %3055 = vmatprep.mubr.msk.f32.mxu0 %vm3517_vm0, %v3518_v23 }
 0x4c1   :  { %v453_v38 = vpop.f32.mrb[4].mxu0 }
 0x4c2   :  { %v457_v39 = vmul.f32 0.35355338, %v453_v38  ;;  %v3052_v40 = vpop.f32.mrb[5].mxu0 }
 0x4c4   :  { %v458_v41 = vsel %vm3815_vm6, %v457_v39, -1e+10 }
 0x4c5   :  { %v459_v42 = vsel %vm382_vm5, %v458_v41, -inf }
 0x4c6   :  { %460 = vmax.xlane.f32.xlu1 %v459_v42 }
 0x4d7   :  { %470 = vrot.lane.b32.xlu1 %v3800_v33, %s3521_s1 }
 0x4db   :  { %548 = vrot.lane.b32.xlu1 %v3800_v33, %s3522_s22 }
 0x4df   :  { %546 = vrot.lane.b32.xlu1 %v3800_v33, %s3523_s2 }
 0x553   :  { %v461_v43 = vpop.xlane.xlu1 %460 }
 0x554   :  { %v462_v44 = vsub.f32 %v458_v41, %v461_v43 }
 0x556   :  { %v463_v45 = vmul.f32 1.442695, %v462_v44 }
 0x557   :  { %v471_v46 = vpop.permute.xlu1 %470 }
 0x558   :  { %3447 = vpow2.f32 %v463_v45  ;;  %3054 = vmatpush3.msra.mxu0 %v471_v46  ;;  %v1064_v45 = vld [vmem:[%s4406_s8] sm:$0xff]  ;;  %v1065_v46 = vld [vmem:[%s4406_s8 + $0x8] sm:$0xff] }
 0x559   :  { %3058 = vmatprep.subr.mxu0 %v3518_v23 }
 0x55b   :  { %v549_v51 = vpop.permute.xlu1 %548 }
 0x55f   :  { %v547_v53 = vpop.permute.xlu1 %546 }
 0x562   :  { %v3448_v47 = vpop.eup %3447 }
 0x563   :  { %v465_v48 = vsel %vm382_vm5, %v3448_v47, 0.0 }
 0x564   :  { %466 = vadd.xlane.f32.xlu0 %v465_v48  ;;  %v1066_v48 = vld [vmem:[%s4406_s8 + $0x10] sm:$0xff] }
 0x57a   :  { %637 = vrot.lane.b32.xlu0 %v3800_v33, %s4425_s23 }
 0x57e   :  { %715 = vrot.lane.b32.xlu0 %v3800_v33, %s3525_s24 }
 0x5f1   :  { %v467_v49 = vpop.xlane.xlu0 %466 }
 0x5f2   :  { %3449 = vrcp.f32 %v467_v49  ;;  %v1067_v49 = vld [vmem:[%s4406_s8 + $0x18] sm:$0xff] }
 0x5f5   :  { %v638_v54 = vpop.permute.xlu0 %637 }
 0x5f9   :  { %v716_v3 = vpop.permute.xlu0 %715 }
 0x5fc   :  { %v3450_v50 = vpop.eup %3449 }
 0x5fd   :  { %v469_v52 = vmul.f32 %v3450_v50, %v3448_v47  ;;  %v3298_v47 = vpack.c.bf16 %v1065_v46, %v1064_v45  ;;  %v3301_v50 = vpack.c.bf16 %v1067_v49, %v1066_v48  ;;  %v1283_v45 = vld [vmem:[%s4412_s14 + $0x60] sm:$0xff]  ;;  %v1284_v46 = vld [vmem:[%s4412_s14 + $0x68] sm:$0xff]  ;;  %v1285_v48 = vld [vmem:[%s4412_s14 + $0x70] sm:$0xff] }
 0x5fe   :  { %v1286_v49 = vld [vmem:[%s4412_s14 + $0x78] sm:$0xff] }
 0x5ff   :  { %3056 = vmatmul.mubr.msk.f32.vlgmr.msra.gmra.mrb[6].mxu0 %vm382_vm5, %v469_v52 }
 0x600   :  { %3059 = vmatpush3.xpose.msk.msra.mxu0 %vm382_vm5, %v549_v51  ;;  %3060 = vmatprep.mubr.msk.f32.mxu0 %vm3517_vm0, %v3518_v23 }
 0x601   :  { %3063 = vmatprep.subr.mxu0 %v3518_v23 }
 0x603   :  { %3061 = vmatmul.mubr.msk.f32.vlgmr.msra.gmra.mrb[8].mxu0 %vm382_vm5, %v547_v53 }
 0x604   :  { %3064 = vmatpush3.msra.mxu0 %v638_v54  ;;  %3065 = vmatprep.mubr.msk.f32.mxu0 %vm3517_vm0, %v3518_v23 }
 0x605   :  { %3068 = vmatprep.subr.mxu0 %v3518_v23 }
 0x6d2   :  { %v3843_v55 = vpop.f32.mrb[6].mxu0 }
 0x6d3   :  { %v3057_v56 = vpop.f32.mrb[7].mxu0 }
 0x6d6   :  { %v620_v57 = vpop.f32.mrb[8].mxu0 }
 0x6d7   :  { %v624_v58 = vmul.f32 0.35355338, %v620_v57  ;;  %v3062_v59 = vpop.f32.mrb[9].mxu0 }
 0x6d9   :  { %v625_v60 = vsel %vm3815_vm6, %v624_v58, -1e+10 }
 0x6da   :  { %v626_v61 = vsel %vm382_vm5, %v625_v60, -inf }
 0x6db   :  { %627 = vmax.xlane.f32.xlu1 %v626_v61 }
 0x6ec   :  { %882 = vrot.lane.b32.xlu1 %v3800_v33, %s4424_s25 }
 0x768   :  { %v628_v62 = vpop.xlane.xlu1 %627 }
 0x769   :  { %v629_v63 = vsub.f32 %v625_v60, %v628_v62  ;;  %v2755_v62 = vld [vmem:[%s4407_s9] ss:$0 sm:$0xff] }
 0x76b   :  { %v630_v0 = vmul.f32 1.442695, %v629_v63 }
 0x76c   :  { %v883_v10 = vpop.permute.xlu1 %882 }
 0x76d   :  { %3451 = vpow2.f32 %v630_v0 }
 0x777   :  { %v3452_v1 = vpop.eup %3451 }
 0x778   :  { %v632_v2 = vsel %vm382_vm5, %v3452_v1, 0.0 }
 0x779   :  { %633 = vadd.xlane.f32.xlu0 %v632_v2 }
 0x78f   :  { %713 = vrot.lane.b32.xlu0 %v3800_v33, %s3527_s26 }
 0x793   :  { %880 = vrot.lane.b32.xlu0 %v3800_v33, %s4428_s27 }
 0x806   :  { %v634_v4 = vpop.xlane.xlu0 %633 }
 0x807   :  { %3453 = vrcp.f32 %v634_v4 }
 0x80a   :  { %v714_v9 = vpop.permute.xlu0 %713 }
 0x80e   :  { %v881_v11 = vpop.permute.xlu0 %880 }
 0x811   :  { %v3454_v5 = vpop.eup %3453 }
 0x812   :  { %v636_v8 = vmul.f32 %v3454_v5, %v3452_v1 }
 0x814   :  { %3066 = vmatmul.mubr.msk.f32.vlgmr.msra.gmra.mrb[10].mxu0 %vm382_vm5, %v636_v8 }
 0x815   :  { %3069 = vmatpush3.xpose.msk.msra.mxu0 %vm382_vm5, %v716_v3  ;;  %3070 = vmatprep.mubr.msk.f32.mxu0 %vm3517_vm0, %v3518_v23 }
 0x816   :  { %3078 = vmatprep.subr.mxu0 %v3518_v23 }
 0x818   :  { %3071 = vmatmul.mubr.msk.f32.vlgmr.msra.gmra.mrb[12].mxu0 %vm382_vm5, %v714_v9 }
 0x819   :  { %3079 = vmatpush3.xpose.msk.msra.mxu0 %vm382_vm5, %v883_v10  ;;  %3080 = vmatprep.mubr.msk.f32.mxu0 %vm3517_vm0, %v3518_v23  ;;  %v1178_v10 = vld [vmem:[%s4410_s12] sm:$0xff] }
 0x81a   :  { %3297 = vmatprep.subr.bf16.mxu0 %v3516_v7 }
 0x81c   :  { %3081 = vmatmul.mubr.msk.f32.vlgmr.msra.gmra.mrb[14].mxu0 %vm382_vm5, %v881_v11 }
 0x81d   :  { %3096 = vmatprep.mubr.msk.f32.mxu0 %vm3517_vm0, %v3518_v23  ;;  %3299 = vmatpush3.bf16.msra.mxu0 %v3298_v47  ;;  %v3328_v47 = vpack.c.bf16 %v1284_v46, %v1283_v45 }
 0x81e   :  { %3300 = vmatprep.subr.bf16.mxu0 %v3516_v7 }
 0x821   :  { %3302 = vmatpush3.bf16.msra.mxu0 %v3301_v50  ;;  %v3331_v50 = vpack.c.bf16 %v1286_v49, %v1285_v48 }
 0x822   :  { %3303 = vmatprep.subr.bf16.mxu0 %v3516_v7 }
 0x8e7   :  { %v709_v12 = vpop.f32.mrb[10].mxu0 }
 0x8e8   :  { %v3067_v13 = vpop.f32.mrb[11].mxu0 }
 0x8e9   :  { %v1181_v13 = vld [vmem:[%s4410_s12 + $0x18] sm:$0xff] }
 0x8eb   :  { %v787_v14 = vpop.f32.mrb[12].mxu0 }
 0x8ec   :  { %v791_v15 = vmul.f32 0.35355338, %v787_v14  ;;  %v3072_v16 = vpop.f32.mrb[13].mxu0 }
 0x8ee   :  { %v792_v17 = vsel %vm3815_vm6, %v791_v15, -1e+10 }
 0x8ef   :  { %v954_v18 = vpop.f32.mrb[14].mxu0  ;;  %v793_v19 = vsel %vm382_vm5, %v792_v17, -inf }
 0x8f0   :  { %v958_v20 = vmul.f32 0.35355338, %v954_v18  ;;  %794 = vmax.xlane.f32.xlu0 %v793_v19  ;;  %v3082_v21 = vpop.f32.mrb[15].mxu0  ;;  %v2757_v19 = vld [vmem:[%s4408_s10] ss:$0 sm:$0xff] }
 0x8f1   :  { %v1271_v21 = vld [vmem:[%s4412_s14] sm:$0xff] }
 0x8f2   :  { %v959_v22 = vsel %vm3815_vm6, %v958_v20, -1e+10 }
 0x8f3   :  { %v960_v24 = vsel %vm382_vm5, %v959_v22, -inf }
 0x8f4   :  { %961 = vmax.xlane.f32.xlu1 %v960_v24  ;;  %v2758_v24 = vld [vmem:[%s4409_s11] ss:$0 sm:$0xff] }
 0x905   :  { %971 = vrot.lane.b32.xlu1 %v3800_v33, %s4421_s3  ;;  %s4426_s3 = smov 24  }
 0x97d   :  { %v795_v25 = vpop.xlane.xlu0 %794 }
 0x97e   :  { %v796_v26 = vsub.f32 %v792_v17, %v795_v25 }
 0x980   :  { %v797_v27 = vmul.f32 1.442695, %v796_v26 }
 0x981   :  { %v962_v28 = vpop.xlane.xlu1 %961 }
 0x982   :  { %3455 = vpow2.f32 %v797_v27  ;;  %v963_v29 = vsub.f32 %v959_v22, %v962_v28  ;;  %v1272_v22 = vld [vmem:[%s4412_s14 + $0x8] sm:$0xff]  ;;  %v1273_v28 = vld [vmem:[%s4412_s14 + $0x10] sm:$0xff] }
 0x983   :  { %v3310_v26 = vpack.c.bf16 %v1272_v22, %v1271_v21  ;;  %v2764_v22 = vld [vmem:[%s4402_s4 + $0x1] ss:$0 sm:$0xff]  ;;  %s4441_s4 = smov 104  }
 0x984   :  { %v964_v30 = vmul.f32 1.442695, %v963_v29  ;;  %v1274_v29 = vld [vmem:[%s4412_s14 + $0x18] sm:$0xff] }
 0x985   :  { %v972_v43 = vpop.permute.xlu1 %971 }
 0x986   :  { %3457 = vpow2.f32 %v964_v30  ;;  %v3313_v30 = vpack.c.bf16 %v1274_v29, %v1273_v28  ;;  %v2771_v28 = vld [vmem:[%s4405_s7 + $0x1] ss:$0 sm:$0xff]  ;;  %s4443_s7 = smov 72  }
 0x98c   :  { %v3456_v31 = vpop.eup %3455 }
 0x98d   :  { %v799_v32 = vsel %vm382_vm5, %v3456_v31, 0.0 }
 0x98e   :  { %800 = vadd.xlane.f32.xlu0 %v799_v32  ;;  %v1276_v32 = vld [vmem:[%s4412_s14 + $0x28] sm:$0xff] }
 0x990   :  { %v3458_v34 = vpop.eup %3457 }
 0x991   :  { %v966_v36 = vsel %vm382_vm5, %v3458_v34, 0.0 }
 0x992   :  { %967 = vadd.xlane.f32.xlu0 %v966_v36  ;;  %v1277_v36 = vld [vmem:[%s4412_s14 + $0x30] sm:$0xff] }
 0x9a8   :  { %804 = vrot.lane.b32.xlu0 %v3800_v33, %s4423_s28  ;;  %s4447_s28 = smov 16  }
 0x9ac   :  { %1048 = vrot.lane.b32.xlu0 %v709_v12, %s4422_s29  ;;  %v1180_v12 = vld [vmem:[%s4410_s12 + $0x10] sm:$0xff]  ;;  %s4448_s29 = smov 24  }
 0x9ad   :  { %v3307_v14 = vpack.c.bf16 %v1181_v13, %v1180_v12  ;;  %v2766_v13 = vld [vmem:[%s4404_s6 + $0x20] sm:$0xff] }
 0xa1b   :  { %v801_v38 = vpop.xlane.xlu0 %800 }
 0xa1c   :  { %3459 = vrcp.f32 %v801_v38  ;;  %v1278_v38 = vld [vmem:[%s4412_s14 + $0x38] sm:$0xff] }
 0xa1f   :  { %v968_v39 = vpop.xlane.xlu0 %967 }
 0xa20   :  { %3461 = vrcp.f32 %v968_v39  ;;  %v3319_v39 = vpack.c.bf16 %v1278_v38, %v1277_v36 }
 0xa23   :  { %v805_v40 = vpop.permute.xlu0 %804 }
 0xa24   :  { %3074 = vmatpush3.msra.mxu1 %v805_v40  ;;  %v1279_v40 = vld [vmem:[%s4412_s14 + $0x40] sm:$0xff] }
 0xa25   :  { %3083 = vmatprep.subr.mxu1 %v3518_v23 }
 0xa26   :  { %v3460_v41 = vpop.eup %3459 }
 0xa27   :  { %v803_v42 = vmul.f32 %v3460_v41, %v3456_v31  ;;  %v1049_v56 = vpop.permute.xlu0 %1048  ;;  %v1275_v31 = vld [vmem:[%s4412_s14 + $0x20] sm:$0xff]  ;;  %v1280_v41 = vld [vmem:[%s4412_s14 + $0x48] sm:$0xff] }
 0xa28   :  { %v1059_v58 = vsel %vm382_vm5, %v3843_v55, %v1049_v56 }
 0xa29   :  { %3076 = vmatmul.mubr.msk.f32.vlgmr.msra.gmra.mrb[2].mxu1 %vm382_vm5, %v803_v42  ;;  %v3322_v42 = vpack.c.bf16 %v1280_v41, %v1279_v40 }
 0xa2a   :  { %v3462_v44 = vpop.eup %3461  ;;  %3084 = vmatpush3.msra.mxu1 %v972_v43  ;;  %3085 = vmatprep.mubr.msk.f32.mxu1 %vm3517_vm0, %v3518_v23  ;;  %v1281_v43 = vld [vmem:[%s4412_s14 + $0x50] sm:$0xff] }
 0xa2b   :  { %v970_v33 = vmul.f32 %v3462_v44, %v3458_v34  ;;  %3156 = vmatprep.subr.mxu1 %v3518_v23  ;;  %v3316_v34 = vpack.c.bf16 %v1276_v32, %v1275_v31  ;;  %v1282_v44 = vld [vmem:[%s4412_s14 + $0x58] sm:$0xff] }
 0xa2d   :  { %3086 = vmatmul.mubr.msk.f32.vlgmr.msra.gmra.mrb[4].mxu1 %vm382_vm5, %v970_v33  ;;  %v3325_v33 = vpack.c.bf16 %v1282_v44, %v1281_v43 }
 0xa2e   :  { %3158 = vmatprep.mubr.msk.f32.mxu1 %vm3517_vm0, %v3518_v23 }
 0xafc   :  { %v876_v51 = vpop.f32.mrb[2].mxu1 }
 0xafd   :  { %1052 = vrot.lane.b32.xlu1 %v876_v51, %s4427_s0  ;;  %v3077_v52 = vpop.f32.mrb[3].mxu1  ;;  %s4440_s0 = sld [smem:[#allocation9_spill]] }
 0xb00   :  { %v1043_v53 = vpop.f32.mrb[4].mxu1 }
 0xb01   :  { %1056 = vrot.lane.b32.xlu0 %v1043_v53, %s4426_s3  ;;  %v3087_v54 = vpop.f32.mrb[5].mxu1 }
 0xb03   :  { %v2759_v51 = vld [vmem:[%s4440_s0] ss:$0 sm:$0xff] }
 0xb6f   :  { %v1053_v57 = vpop.permute.xlu1 %1052 }
 0xb70   :  { %v1061_v59 = vsel %vm1060_vm7, %v1059_v58, %v1053_v57 }
 0xb73   :  { %v1057_v60 = vpop.permute.xlu0 %1056 }
 0xb74   :  { %v1063_v61 = vsel %vm1062_vm8, %v1061_v59, %v1057_v60 }
 0xb75   :  { %3097 = vmatmul.mubr.msk.f32.vlgmr.msra.gmra.mrb[16].mxu0 %vm118_vm3, %v1063_v61 }
 0xb76   :  { %3107 = vmatprep.mubr.msk.f32.mxu0 %vm3517_vm0, %v3518_v23 }
 0xc48   :  { %v1144_v63 = vpop.f32.mrb[16].mxu0 }
 0xc49   :  { %v1145_v0 = vadd.f32 %v2755_v62, %v1144_v63  ;;  %v3098_v1 = vpop.f32.mrb[17].mxu0 }
 0xc4a   :  { %v2761_v1 = vld [vmem:[%s4413_s15] ss:$0 sm:$0xff] }
 0xc4b   :  { %v3916_v2 = vadd.f32 %v1145_v0, %v3768_v6  ;;  %v1179_v6 = vld [vmem:[%s4410_s12 + $0x8] sm:$0xff] }
 0xc4c   :  { %v3304_v11 = vpack.c.bf16 %v1179_v6, %v1178_v10 }
 0xc4d   :  { %v1151_v55 = vsel %vm118_vm3, %v3916_v2, 0.0 }
 0xc4e   :  { %1152 = vadd.xlane.f32.xlu1 %v1151_v55  ;;  %3305 = vmatpush3.bf16.msra.mxu0 %v3304_v11 }
 0xc4f   :  { %3306 = vmatprep.subr.bf16.mxu0 %v3516_v7 }
 0xc52   :  { %3308 = vmatpush3.bf16.msra.mxu0 %v3307_v14 }
 0xc53   :  { %3309 = vmatprep.subr.bf16.mxu0 %v3516_v7 }
 0xcdb   :  { %v1153_v3 = vpop.xlane.xlu1 %1152 }
 0xcdc   :  { %v1154_v4 = vmul.f32 0.03125, %v1153_v3 }
 0xcde   :  { %v1155_v5 = vsub.f32 %v3916_v2, %v1154_v4 }
 0xce0   :  { %v1156_v8 = vmul.f32 %v1155_v5, %v1155_v5 }
 0xce2   :  { %v1157_v9 = vsel %vm118_vm3, %v1156_v8, 0.0 }
 0xce3   :  { %1158 = vadd.xlane.f32.xlu0 %v1157_v9 }
 0xd70   :  { %v1159_v15 = vpop.xlane.xlu0 %1158 }
 0xd71   :  { %v1160_v16 = vmul.f32 0.03125, %v1159_v15  ;;  %v2768_v15 = vld [vmem:[%s4404_s6 + $0x30] sm:$0xff] }
 0xd73   :  { %v1161_v17 = vadd.f32 1e-05, %v1160_v16  ;;  %v2769_v16 = vld [vmem:[%s4404_s6 + $0x38] sm:$0xff] }
 0xd75   :  { %3463 = vrsqrt.f32 %v1161_v17  ;;  %v3337_v17 = vpack.c.bf16 %v2769_v16, %v2768_v15 }
 0xd7f   :  { %v3464_v18 = vpop.eup %3463 }
 0xd80   :  { %v1163_v20 = vmul.f32 %v3464_v18, %v1155_v5 }
 0xd82   :  { %v1170_v25 = vmul.f32 %v2757_v19, %v1163_v20 }
 0xd84   :  { %v1177_v27 = vadd.f32 %v2758_v24, %v1170_v25  ;;  %v2765_v25 = vld [vmem:[%s4403_s5 + $0x1] ss:$0 sm:$0xff]  ;;  %s4442_s5 = smov 56  }
 0xd86   :  { %3108 = vmatmul.mubr.msk.f32.vlgmr.msra.gmra.mrb[18].mxu0 %vm118_vm3, %v1177_v27 }
 0xd87   :  { %3311 = vmatpush3.bf16.msra.mxu0 %v3310_v26  ;;  %3142 = vmatprep.mubr.msk.f32.mxu0 %vm3517_vm0, %v3518_v23 }
 0xd88   :  { %3312 = vmatprep.subr.bf16.mxu0 %v3516_v7 }
 0xd8b   :  { %3314 = vmatpush3.bf16.msra.mxu0 %v3313_v30 }
 0xd8c   :  { %3315 = vmatprep.subr.bf16.mxu0 %v3516_v7 }
 0xd8f   :  { %3317 = vmatpush3.bf16.msra.mxu0 %v3316_v34 }
 0xd90   :  { %3318 = vmatprep.subr.bf16.mxu0 %v3516_v7 }
 0xd93   :  { %3320 = vmatpush3.bf16.msra.mxu0 %v3319_v39 }
 0xd94   :  { %3321 = vmatprep.subr.bf16.mxu0 %v3516_v7 }
 0xd97   :  { %3323 = vmatpush3.bf16.msra.mxu0 %v3322_v42 }
 0xd98   :  { %3324 = vmatprep.subr.bf16.mxu0 %v3516_v7 }
 0xd9b   :  { %3326 = vmatpush3.bf16.msra.mxu0 %v3325_v33 }
 0xd9c   :  { %3327 = vmatprep.subr.bf16.mxu0 %v3516_v7 }
 0xd9f   :  { %3329 = vmatpush3.bf16.msra.mxu0 %v3328_v47 }
 0xda0   :  { %3330 = vmatprep.subr.bf16.mxu0 %v3516_v7 }
 0xda3   :  { %3332 = vmatpush3.bf16.msra.mxu0 %v3331_v50 }
 0xda4   :  { %3333 = vmatprep.subr.bf16.mxu0 %v3516_v7 }
 0xe59   :  { %v1258_v52 = vpop.f32.mrb[18].mxu0 }
 0xe5a   :  { %v1259_v53 = vadd.f32 %v2759_v51, %v1258_v52  ;;  %v3109_v54 = vpop.f32.mrb[19].mxu0 }
 0xe5c   :  { %v1263_v56 = vmul.f32 %v1259_v53, %v1259_v53  ;;  %v1262_v62 = vmul.f32 0.5, %v1259_v53 }
 0xe5e   :  { %v1264_v57 = vmul.f32 %v1263_v56, %v1259_v53 }
 0xe60   :  { %v1265_v58 = vmul.f32 0.044715, %v1264_v57 }
 0xe62   :  { %v1266_v59 = vadd.f32 %v1265_v58, %v1259_v53 }
 0xe64   :  { %v1267_v60 = vmul.f32 0.7978846, %v1266_v59 }
 0xe66   :  { %3465 = vtanh.f32 %v1267_v60 }
 0xe70   :  { %v3466_v61 = vpop.eup %3465 }
 0xe71   :  { %v1269_v63 = vadd.f32 1.0, %v3466_v61 }
 0xe73   :  { %v1270_v0 = vmul.f32 %v1269_v63, %v1262_v62 }
 0xe75   :  { %3143 = vmatmul.mubr.f32.vlgmr.msra.gmra.mrb[20].mxu0 %v1270_v0 }
 0xe76   :  { %3153 = vmatprep.mubr.msk.f32.mxu0 %vm3517_vm0, %v3518_v23 }
 0xf48   :  { %v1360_v55 = vpop.f32.mrb[20].mxu0 }
 0xf49   :  { %v1361_v3 = vadd.f32 %v2761_v1, %v1360_v55  ;;  %v3144_v4 = vpop.f32.mrb[21].mxu0 }
 0xf4b   :  { %v4010_v5 = vadd.f32 %v1361_v3, %v3916_v2  ;;  %v2767_v2 = vld [vmem:[%s4404_s6 + $0x28] sm:$0xff] }
 0xf4c   :  { %v3334_v14 = vpack.c.bf16 %v2767_v2, %v2766_v13 }
 0xf4d   :  { %v1369_v8 = vsel %vm118_vm3, %v4010_v5, 0.0 }
 0xf4e   :  { %1370 = vadd.xlane.f32.xlu0 %v1369_v8  ;;  %3335 = vmatpush3.bf16.msra.mxu0 %v3334_v14 }
 0xf4f   :  { %3336 = vmatprep.subr.bf16.mxu0 %v3516_v7 }
 0xf52   :  { %3338 = vmatpush3.bf16.msra.mxu0 %v3337_v17 }
 0xf53   :  { %3186 = vmatprep.subr.mxu0 %v3518_v23 }
 0xfdb   :  { %v1371_v9 = vpop.xlane.xlu0 %1370 }
 0xfdc   :  { %v1372_v10 = vmul.f32 0.03125, %v1371_v9 }
 0xfde   :  { %v1373_v6 = vsub.f32 %v4010_v5, %v1372_v10 }
 0xfe0   :  { %v1374_v11 = vmul.f32 %v1373_v6, %v1373_v6 }
 0xfe2   :  { %v1375_v12 = vsel %vm118_vm3, %v1374_v11, 0.0 }
 0xfe3   :  { %1376 = vadd.xlane.f32.xlu1 %v1375_v12 }
0x1070   :  { %v1377_v18 = vpop.xlane.xlu1 %1376 }
0x1071   :  { %v1378_v19 = vmul.f32 0.03125, %v1377_v18 }
0x1073   :  { %v1379_v20 = vadd.f32 1e-05, %v1378_v19 }
0x1075   :  { %3467 = vrsqrt.f32 %v1379_v20 }
0x107f   :  { %v3468_v21 = vpop.eup %3467 }
0x1080   :  { %v1381_v24 = vmul.f32 %v3468_v21, %v1373_v6 }
0x1082   :  { %v1388_v26 = vmul.f32 %v2764_v22, %v1381_v24 }
0x1084   :  { %v1395_v27 = vadd.f32 %v2765_v25, %v1388_v26 }
0x1086   :  { %3154 = vmatmul.mubr.msk.f32.vlgmr.msra.gmra.mrb[22].mxu0 %vm118_vm3, %v1395_v27 }
0x1087   :  { %3188 = vmatprep.mubr.msk.f32.mxu0 %vm3517_vm0, %v3518_v23 }
0x1159   :  { %v1478_v29 = vpop.f32.mrb[22].mxu0 }
0x115a   :  { %v4042_v30 = vadd.f32 %v2771_v28, %v1478_v29  ;;  %v3155_v31 = vpop.f32.mrb[23].mxu0 }
0x115c   :  { %1483 = vrot.lane.b32.xlu0 %v4042_v30, %s3520_s21  ;;  %s4444_s21 = smov 48  }
0x1160   :  { %1650 = vrot.lane.b32.xlu0 %v4042_v30, %s3522_s22  ;;  %s4446_s22 = smov 40  }
0x1164   :  { %1648 = vrot.lane.b32.xlu0 %v4042_v30, %s3523_s2 }
0x11ce   :  { %v1484_v32 = vpop.permute.xlu0 %1483 }
0x11cf   :  { %3157 = vmatpush3.xpose.msk.msra.mxu1 %vm382_vm5, %v1484_v32 }
0x11d0   :  { %3161 = vmatprep.subr.mxu1 %v3518_v23 }
0x11d2   :  { %3159 = vmatmul.mubr.msk.f32.vlgmr.msra.gmra.mrb[6].mxu1 %vm382_vm5, %v4042_v30  ;;  %v1651_v48 = vpop.permute.xlu0 %1650 }
0x11d3   :  { %3163 = vmatprep.mubr.msk.f32.mxu1 %vm3517_vm0, %v3518_v23 }
0x11d6   :  { %v1649_v50 = vpop.permute.xlu0 %1648 }
0x12a5   :  { %v1555_v34 = vpop.f32.mrb[6].mxu1 }
0x12a6   :  { %v1559_v36 = vmul.f32 0.35355338, %v1555_v34  ;;  %v3160_v38 = vpop.f32.mrb[7].mxu1 }
0x12a8   :  { %v1560_v39 = vsel %vm3815_vm6, %v1559_v36, -1e+10 }
0x12a9   :  { %v1561_v40 = vsel %vm382_vm5, %v1560_v39, -inf }
0x12aa   :  { %1562 = vmax.xlane.f32.xlu1 %v1561_v40 }
0x1337   :  { %v1563_v41 = vpop.xlane.xlu1 %1562 }
0x1338   :  { %v1564_v42 = vsub.f32 %v1560_v39, %v1563_v41 }
0x133a   :  { %v1565_v43 = vmul.f32 1.442695, %v1564_v42 }
0x133c   :  { %3469 = vpow2.f32 %v1565_v43  ;;  %v2785_v43 = vld [vmem:[%s4406_s8 + $0x20] sm:$0xff] }
0x1346   :  { %v3470_v44 = vpop.eup %3469 }
0x1347   :  { %v1567_v33 = vsel %vm382_vm5, %v3470_v44, 0.0 }
0x1348   :  { %1568 = vadd.xlane.f32.xlu1 %v1567_v33 }
0x1359   :  { %1572 = vrot.lane.b32.xlu1 %v4042_v30, %s3521_s1  ;;  %s4445_s1 = smov 8  }
0x13d5   :  { %v1569_v45 = vpop.xlane.xlu1 %1568 }
0x13d6   :  { %3471 = vrcp.f32 %v1569_v45  ;;  %v2787_v45 = vld [vmem:[%s4406_s8 + $0x30] sm:$0xff] }
0x13d9   :  { %v1573_v46 = vpop.permute.xlu1 %1572 }
0x13da   :  { %3162 = vmatpush3.msra.mxu1 %v1573_v46  ;;  %v2788_v46 = vld [vmem:[%s4406_s8 + $0x38] sm:$0xff] }
0x13db   :  { %3166 = vmatprep.subr.mxu1 %v3518_v23 }
0x13e0   :  { %v3472_v47 = vpop.eup %3471 }
0x13e1   :  { %v1571_v49 = vmul.f32 %v3472_v47, %v3470_v44  ;;  %v2786_v44 = vld [vmem:[%s4406_s8 + $0x28] sm:$0xff]  ;;  %v3343_v47 = vpack.c.bf16 %v2788_v46, %v2787_v45  ;;  %v2818_v45 = vld [vmem:[%s4412_s14 + $0xf8] sm:$0xff] }
0x13e2   :  { %v3340_v33 = vpack.c.bf16 %v2786_v44, %v2785_v43  ;;  %v2816_v43 = vld [vmem:[%s4412_s14 + $0xe8] sm:$0xff] }
0x13e3   :  { %3164 = vmatmul.mubr.msk.f32.vlgmr.msra.gmra.mrb[8].mxu1 %vm382_vm5, %v1571_v49 }
0x13e4   :  { %3167 = vmatpush3.xpose.msk.msra.mxu1 %vm382_vm5, %v1651_v48  ;;  %3168 = vmatprep.mubr.msk.f32.mxu1 %vm3517_vm0, %v3518_v23 }
0x13e5   :  { %3171 = vmatprep.subr.mxu1 %v3518_v23 }
0x13e7   :  { %3169 = vmatmul.mubr.msk.f32.vlgmr.msra.gmra.mrb[10].mxu1 %vm382_vm5, %v1649_v50 }
0x13e8   :  { %3173 = vmatprep.mubr.msk.f32.mxu1 %vm3517_vm0, %v3518_v23 }
0x14b6   :  { %v4071_v51 = vpop.f32.mrb[8].mxu1 }
0x14b7   :  { %v3165_v52 = vpop.f32.mrb[9].mxu1 }
0x14ba   :  { %v1722_v53 = vpop.f32.mrb[10].mxu1 }
0x14bb   :  { %v1726_v54 = vmul.f32 0.35355338, %v1722_v53  ;;  %v3170_v56 = vpop.f32.mrb[11].mxu1 }
0x14bd   :  { %v1727_v57 = vsel %vm3815_vm6, %v1726_v54, -1e+10 }
0x14be   :  { %v1728_v58 = vsel %vm382_vm5, %v1727_v57, -inf }
0x14bf   :  { %1729 = vmax.xlane.f32.xlu1 %v1728_v58 }
0x14d0   :  { %1817 = vrot.lane.b32.xlu1 %v4042_v30, %s3525_s24 }
0x14d4   :  { %1815 = vrot.lane.b32.xlu1 %v4042_v30, %s3527_s26 }
0x14d8   :  { %1982 = vrot.lane.b32.xlu1 %v4042_v30, %s4441_s4 }
0x154c   :  { %v1730_v59 = vpop.xlane.xlu1 %1729 }
0x154d   :  { %v1731_v60 = vsub.f32 %v1727_v57, %v1730_v59 }
0x154f   :  { %v1732_v61 = vmul.f32 1.442695, %v1731_v60  ;;  %v2790_v60 = vld [vmem:[%s4407_s9 + $0x1] ss:$0 sm:$0xff] }
0x1550   :  { %v1818_v0 = vpop.permute.xlu1 %1817 }
0x1551   :  { %3473 = vpow2.f32 %v1732_v61 }
0x1554   :  { %v1816_v3 = vpop.permute.xlu1 %1815 }
0x1558   :  { %v1983_v9 = vpop.permute.xlu1 %1982 }
0x155b   :  { %v3474_v62 = vpop.eup %3473 }
0x155c   :  { %v1734_v63 = vsel %vm382_vm5, %v3474_v62, 0.0 }
0x155d   :  { %1735 = vadd.xlane.f32.xlu0 %v1734_v63 }
0x1573   :  { %1739 = vrot.lane.b32.xlu0 %v4042_v30, %s4442_s5 }
0x1577   :  { %1984 = vrot.lane.b32.xlu0 %v4042_v30, %s4443_s7 }
0x15ea   :  { %v1736_v1 = vpop.xlane.xlu0 %1735 }
0x15eb   :  { %3475 = vrcp.f32 %v1736_v1 }
0x15ee   :  { %v1740_v55 = vpop.permute.xlu0 %1739 }
0x15ef   :  { %3172 = vmatpush3.msra.mxu1 %v1740_v55 }
0x15f0   :  { %3176 = vmatprep.subr.mxu1 %v3518_v23 }
0x15f2   :  { %v1985_v4 = vpop.permute.xlu0 %1984 }
0x15f3   :  { %3187 = vmatpush3.xpose.msk.msra.mxu0 %vm382_vm5, %v1985_v4 }
0x15f4   :  { %3339 = vmatprep.subr.bf16.mxu0 %v3516_v7 }
0x15f5   :  { %v3476_v8 = vpop.eup %3475 }
0x15f6   :  { %v1738_v10 = vmul.f32 %v3476_v8, %v3474_v62  ;;  %3189 = vmatmul.mubr.msk.f32.vlgmr.msra.gmra.mrb[24].mxu0 %vm382_vm5, %v1983_v9  ;;  %v2796_v8 = vld [vmem:[%s4410_s12 + $0x20] sm:$0xff] }
0x15f7   :  { %3204 = vmatprep.mubr.msk.f32.mxu0 %vm3517_vm0, %v3518_v23  ;;  %3341 = vmatpush3.bf16.msra.mxu0 %v3340_v33  ;;  %v2817_v33 = vld [vmem:[%s4412_s14 + $0xf0] sm:$0xff] }
0x15f8   :  { %3174 = vmatmul.mubr.msk.f32.vlgmr.msra.gmra.mrb[12].mxu1 %vm382_vm5, %v1738_v10  ;;  %3342 = vmatprep.subr.bf16.mxu0 %v3516_v7  ;;  %v2798_v10 = vld [vmem:[%s4410_s12 + $0x30] sm:$0xff]  ;;  %v3373_v46 = vpack.c.bf16 %v2818_v45, %v2817_v33 }
0x15f9   :  { %3177 = vmatpush3.xpose.msk.msra.mxu1 %vm382_vm5, %v1818_v0  ;;  %3178 = vmatprep.mubr.msk.f32.mxu1 %vm3517_vm0, %v3518_v23 }
0x15fa   :  { %3181 = vmatprep.subr.mxu1 %v3518_v23 }
0x15fb   :  { %3344 = vmatpush3.bf16.msra.mxu0 %v3343_v47  ;;  %v2801_v47 = vld [vmem:[%s4440_s0 + $0x1] ss:$0 sm:$0xff] }
0x15fc   :  { %3179 = vmatmul.mubr.msk.f32.vlgmr.msra.gmra.mrb[14].mxu1 %vm382_vm5, %v1816_v3  ;;  %3351 = vmatprep.subr.bf16.mxu0 %v3516_v7 }
0x15fd   :  { %3183 = vmatprep.mubr.msk.f32.mxu1 %vm3517_vm0, %v3518_v23 }
0x16c9   :  { %v2056_v6 = vpop.f32.mrb[24].mxu0 }
0x16ca   :  { %v2060_v11 = vmul.f32 0.35355338, %v2056_v6  ;;  %v3190_v12 = vpop.f32.mrb[25].mxu0  ;;  %v2799_v6 = vld [vmem:[%s4410_s12 + $0x38] sm:$0xff] }
0x16cb   :  { %v1811_v13 = vpop.f32.mrb[12].mxu1  ;;  %v2803_v12 = vld [vmem:[%s4412_s14 + $0x80] sm:$0xff] }
0x16cc   :  { %v3175_v2 = vpop.f32.mrb[13].mxu1  ;;  %v2061_v14 = vsel %vm3815_vm6, %v2060_v11, -1e+10  ;;  %v3349_v11 = vpack.c.bf16 %v2799_v6, %v2798_v10  ;;  %v2530_v6 = vld [vmem:[%s4435_s13 + $0x98] sm:$0xff] }
0x16cd   :  { %v2062_v15 = vsel %vm382_vm5, %v2061_v14, -inf }
0x16ce   :  { %2063 = vmax.xlane.f32.xlu1 %v2062_v15 }
0x16cf   :  { %v1889_v16 = vpop.f32.mrb[14].mxu1 }
0x16d0   :  { %v1893_v17 = vmul.f32 0.35355338, %v1889_v16  ;;  %v3180_v18 = vpop.f32.mrb[15].mxu1 }
0x16d1   :  { %v2794_v18 = vld [vmem:[%s4408_s10 + $0x1] ss:$0 sm:$0xff] }
0x16d2   :  { %v1894_v19 = vsel %vm3815_vm6, %v1893_v17, -1e+10 }
0x16d3   :  { %v1895_v20 = vsel %vm382_vm5, %v1894_v19, -inf }
0x16d4   :  { %1896 = vmax.xlane.f32.xlu0 %v1895_v20  ;;  %v2795_v20 = vld [vmem:[%s4409_s11 + $0x1] ss:$0 sm:$0xff] }
0x16df   :  { %1906 = vrot.lane.b32.xlu1 %v4042_v30, %s4444_s21 }
0x16e3   :  { %2150 = vrot.lane.b32.xlu1 %v1811_v13, %s4445_s1  ;;  %v2804_v13 = vld [vmem:[%s4412_s14 + $0x88] sm:$0xff] }
0x16e4   :  { %v3352_v2 = vpack.c.bf16 %v2804_v13, %v2803_v12  ;;  %v2514_v12 = vld [vmem:[%s4435_s13 + $0x18] sm:$0xff]  ;;  %v2531_v13 = vld [vmem:[%s4435_s13 + $0xa0] sm:$0xff] }
0x175b   :  { %v2064_v21 = vpop.xlane.xlu1 %2063 }
0x175c   :  { %v2065_v22 = vsub.f32 %v2061_v14, %v2064_v21 }
0x175e   :  { %v2066_v24 = vmul.f32 1.442695, %v2065_v22 }
0x175f   :  { %v1907_v25 = vpop.permute.xlu1 %1906 }
0x1760   :  { %3477 = vpow2.f32 %v2066_v24  ;;  %3182 = vmatpush3.msra.mxu1 %v1907_v25  ;;  %v2805_v24 = vld [vmem:[%s4412_s14 + $0x90] sm:$0xff]  ;;  %v2806_v25 = vld [vmem:[%s4412_s14 + $0x98] sm:$0xff] }
0x1761   :  { %v1897_v26 = vpop.xlane.xlu0 %1896  ;;  %3191 = vmatprep.subr.mxu1 %v3518_v23 }
0x1762   :  { %v1898_v27 = vsub.f32 %v1894_v19, %v1897_v26  ;;  %v3355_v26 = vpack.c.bf16 %v2806_v25, %v2805_v24  ;;  %v2518_v24 = vld [vmem:[%s4435_s13 + $0x38] sm:$0xff]  ;;  %v2535_v25 = vld [vmem:[%s4435_s13 + $0xc0] sm:$0xff] }
0x1763   :  { %v2151_v53 = vpop.permute.xlu1 %2150 }
0x1764   :  { %v1899_v37 = vmul.f32 1.442695, %v1898_v27  ;;  %v2161_v56 = vsel %vm382_vm5, %v4071_v51, %v2151_v53  ;;  %v2807_v27 = vld [vmem:[%s4412_s14 + $0xa0] sm:$0xff] }
0x1766   :  { %3479 = vpow2.f32 %v1899_v37  ;;  %v2808_v37 = vld [vmem:[%s4412_s14 + $0xa8] sm:$0xff] }
0x176a   :  { %v3478_v28 = vpop.eup %3477 }
0x176b   :  { %v2068_v29 = vsel %vm382_vm5, %v3478_v28, 0.0 }
0x176c   :  { %2069 = vadd.xlane.f32.xlu0 %v2068_v29  ;;  %v2809_v29 = vld [vmem:[%s4412_s14 + $0xb0] sm:$0xff] }
0x1770   :  { %v3480_v31 = vpop.eup %3479 }
0x1771   :  { %v1901_v32 = vsel %vm382_vm5, %v3480_v31, 0.0 }
0x1772   :  { %1902 = vadd.xlane.f32.xlu0 %v1901_v32 }
0x1788   :  { %2073 = vrot.lane.b32.xlu0 %v4042_v30, %s4446_s22 }
0x17f9   :  { %v2070_v34 = vpop.xlane.xlu0 %2069 }
0x17ff   :  { %v1903_v36 = vpop.xlane.xlu0 %1902 }
0x1800   :  { %3481 = vrcp.f32 %v1903_v36  ;;  %v2812_v36 = vld [vmem:[%s4412_s14 + $0xc8] sm:$0xff] }
0x1801   :  { %3483 = vrcp.f32 %v2070_v34  ;;  %v2811_v34 = vld [vmem:[%s4412_s14 + $0xc0] sm:$0xff] }
0x1803   :  { %v2074_v41 = vpop.permute.xlu0 %2073 }
0x180a   :  { %v3482_v38 = vpop.eup %3481 }
0x180b   :  { %v1905_v39 = vmul.f32 %v3482_v38, %v3480_v31  ;;  %v3484_v40 = vpop.eup %3483  ;;  %v2810_v31 = vld [vmem:[%s4412_s14 + $0xb8] sm:$0xff]  ;;  %v3364_v38 = vpack.c.bf16 %v2812_v36, %v2811_v34 }
0x180c   :  { %v2072_v42 = vmul.f32 %v3484_v40, %v3478_v28  ;;  %v3358_v28 = vpack.c.bf16 %v2808_v37, %v2807_v27  ;;  %v3361_v32 = vpack.c.bf16 %v2810_v31, %v2809_v29  ;;  %v2814_v40 = vld [vmem:[%s4412_s14 + $0xd8] sm:$0xff]  ;;  %v2520_v29 = vld [vmem:[%s4435_s13 + $0x48] sm:$0xff]  ;;  %v2537_v31 = vld [vmem:[%s4435_s13 + $0xd0] sm:$0xff] }
0x180d   :  { %3184 = vmatmul.mubr.msk.f32.vlgmr.msra.gmra.mrb[16].mxu1 %vm382_vm5, %v1905_v39  ;;  %v2813_v39 = vld [vmem:[%s4412_s14 + $0xd0] sm:$0xff] }
0x180e   :  { %3192 = vmatpush3.msra.mxu1 %v2074_v41  ;;  %3193 = vmatprep.mubr.msk.f32.mxu1 %vm3517_vm0, %v3518_v23  ;;  %v3367_v41 = vpack.c.bf16 %v2814_v40, %v2813_v39  ;;  %v2522_v39 = vld [vmem:[%s4435_s13 + $0x58] sm:$0xff] }
0x180f   :  { %3345 = vmatprep.subr.bf16.mxu1 %v3516_v7 }
0x1811   :  { %3194 = vmatmul.mubr.msk.f32.vlgmr.msra.gmra.mrb[18].mxu1 %vm382_vm5, %v2072_v42  ;;  %v2815_v42 = vld [vmem:[%s4412_s14 + $0xe0] sm:$0xff] }
0x1812   :  { %3215 = vmatprep.mubr.msk.f32.mxu1 %vm3517_vm0, %v3518_v23  ;;  %v3370_v44 = vpack.c.bf16 %v2816_v43, %v2815_v42 }
0x18e0   :  { %v1978_v48 = vpop.f32.mrb[16].mxu1 }
0x18e1   :  { %2154 = vrot.lane.b32.xlu1 %v1978_v48, %s4447_s28  ;;  %v3185_v49 = vpop.f32.mrb[17].mxu1 }
0x18e4   :  { %v2145_v50 = vpop.f32.mrb[18].mxu1 }
0x18e5   :  { %2158 = vrot.lane.b32.xlu0 %v2145_v50, %s4448_s29  ;;  %v3195_v52 = vpop.f32.mrb[19].mxu1 }
0x1953   :  { %v2155_v54 = vpop.permute.xlu1 %2154 }
0x1954   :  { %v2162_v57 = vsel %vm1060_vm7, %v2161_v56, %v2155_v54 }
0x1957   :  { %v2159_v58 = vpop.permute.xlu0 %2158 }
0x1958   :  { %v2163_v59 = vsel %vm1062_vm8, %v2162_v57, %v2159_v58 }
0x1959   :  { %3205 = vmatmul.mubr.msk.f32.vlgmr.msra.gmra.mrb[26].mxu0 %vm118_vm3, %v2163_v59 }
0x195a   :  { %3250 = vmatprep.mubr.msk.f32.mxu0 %vm3517_vm0, %v3518_v23  ;;  %3353 = vmatpush3.bf16.msra.mxu0 %v3352_v2  ;;  %v2532_v2 = vld [vmem:[%s4435_s13 + $0xa8] sm:$0xff] }
0x195b   :  { %3354 = vmatprep.subr.bf16.mxu0 %v3516_v7 }
0x195e   :  { %3356 = vmatpush3.bf16.msra.mxu0 %v3355_v26  ;;  %v2536_v26 = vld [vmem:[%s4435_s13 + $0xc8] sm:$0xff] }
0x195f   :  { %3357 = vmatprep.subr.bf16.mxu0 %v3516_v7  ;;  %v3399_v37 = vpack.c.bf16 %v2536_v26, %v2535_v25 }
0x1962   :  { %3359 = vmatpush3.bf16.msra.mxu0 %v3358_v28  ;;  %v2519_v28 = vld [vmem:[%s4435_s13 + $0x40] sm:$0xff] }
0x1963   :  { %3360 = vmatprep.subr.bf16.mxu0 %v3516_v7  ;;  %v3402_v34 = vpack.c.bf16 %v2520_v29, %v2519_v28 }
0x1966   :  { %3362 = vmatpush3.bf16.msra.mxu0 %v3361_v32  ;;  %v2538_v32 = vld [vmem:[%s4435_s13 + $0xd8] sm:$0xff] }
0x1967   :  { %3363 = vmatprep.subr.bf16.mxu0 %v3516_v7  ;;  %v3405_v36 = vpack.c.bf16 %v2538_v32, %v2537_v31 }
0x196a   :  { %3365 = vmatpush3.bf16.msra.mxu0 %v3364_v38  ;;  %v2521_v38 = vld [vmem:[%s4435_s13 + $0x50] sm:$0xff] }
0x196b   :  { %3366 = vmatprep.subr.bf16.mxu0 %v3516_v7  ;;  %v3408_v40 = vpack.c.bf16 %v2522_v39, %v2521_v38 }
0x196e   :  { %3368 = vmatpush3.bf16.msra.mxu0 %v3367_v41 }
0x196f   :  { %3369 = vmatprep.subr.bf16.mxu0 %v3516_v7 }
0x1972   :  { %3371 = vmatpush3.bf16.msra.mxu0 %v3370_v44 }
0x1973   :  { %3372 = vmatprep.subr.bf16.mxu0 %v3516_v7 }
0x1976   :  { %3374 = vmatpush3.bf16.msra.mxu0 %v3373_v46 }
0x1a2c   :  { %v2246_v61 = vpop.f32.mrb[26].mxu0 }
0x1a2d   :  { %v2247_v62 = vadd.f32 %v2790_v60, %v2246_v61  ;;  %v3206_v63 = vpop.f32.mrb[27].mxu0 }
0x1a2f   :  { %v4149_v0 = vadd.f32 %v2247_v62, %v4010_v5  ;;  %v2797_v5 = vld [vmem:[%s4410_s12 + $0x28] sm:$0xff] }
0x1a30   :  { %v3346_v9 = vpack.c.bf16 %v2797_v5, %v2796_v8  ;;  %v2511_v8 = vld [vmem:[%s4435_s13] sm:$0xff]  ;;  %v2512_v5 = vld [vmem:[%s4435_s13 + $0x8] sm:$0xff] }
0x1a31   :  { %v2255_v51 = vsel %vm118_vm3, %v4149_v0, 0.0  ;;  %v3378_v10 = vpack.c.bf16 %v2512_v5, %v2511_v8 }
0x1a32   :  { %2256 = vadd.xlane.f32.xlu1 %v2255_v51  ;;  %3347 = vmatpush3.bf16.msra.mxu1 %v3346_v9  ;;  %v2529_v9 = vld [vmem:[%s4435_s13 + $0x90] sm:$0xff] }
0x1a33   :  { %3348 = vmatprep.subr.bf16.mxu1 %v3516_v7  ;;  %v2820_v7 = vld [vmem:[%s4413_s15 + $0x1] ss:$0 sm:$0xff]  ;;  %s3534_s15 = smov 32  }
0x1a36   :  { %3350 = vmatpush3.bf16.msra.mxu1 %v3349_v11  ;;  %v2513_v11 = vld [vmem:[%s4435_s13 + $0x10] sm:$0xff] }
0x1abf   :  { %v2257_v1 = vpop.xlane.xlu1 %2256 }
0x1ac0   :  { %v2258_v55 = vmul.f32 0.03125, %v2257_v1 }
0x1ac2   :  { %v2259_v3 = vsub.f32 %v4149_v0, %v2258_v55 }
0x1ac4   :  { %v2260_v4 = vmul.f32 %v2259_v3, %v2259_v3 }
0x1ac6   :  { %v2261_v23 = vsel %vm118_vm3, %v2260_v4, 0.0  ;;  %v2528_v4 = vld [vmem:[%s4435_s13 + $0x88] sm:$0xff] }
0x1ac7   :  { %2262 = vadd.xlane.f32.xlu0 %v2261_v23 }
0x1b54   :  { %v2263_v14 = vpop.xlane.xlu0 %2262 }
0x1b55   :  { %v2264_v15 = vmul.f32 0.03125, %v2263_v14  ;;  %v3384_v14 = vpack.c.bf16 %v2514_v12, %v2513_v11 }
0x1b57   :  { %v2265_v16 = vadd.f32 1e-05, %v2264_v15  ;;  %v3387_v15 = vpack.c.bf16 %v2532_v2, %v2531_v13 }
0x1b59   :  { %3485 = vrsqrt.f32 %v2265_v16  ;;  %v2515_v16 = vld [vmem:[%s4435_s13 + $0x20] sm:$0xff] }
0x1b63   :  { %v3486_v17 = vpop.eup %3485 }
0x1b64   :  { %v2267_v19 = vmul.f32 %v3486_v17, %v2259_v3  ;;  %v2527_v3 = vld [vmem:[%s4435_s13 + $0x80] sm:$0xff]  ;;  %v2516_v17 = vld [vmem:[%s4435_s13 + $0x28] sm:$0xff] }
0x1b66   :  { %v2274_v21 = vmul.f32 %v2794_v18, %v2267_v19  ;;  %v2533_v18 = vld [vmem:[%s4435_s13 + $0xb0] sm:$0xff]  ;;  %v2534_v19 = vld [vmem:[%s4435_s13 + $0xb8] sm:$0xff] }
0x1b68   :  { %v2281_v22 = vadd.f32 %v2795_v20, %v2274_v21  ;;  %v3390_v20 = vpack.c.bf16 %v2516_v17, %v2515_v16  ;;  %v3393_v21 = vpack.c.bf16 %v2534_v19, %v2533_v18 }
0x1b6a   :  { %3216 = vmatmul.mubr.msk.f32.vlgmr.msra.gmra.mrb[20].mxu1 %vm118_vm3, %v2281_v22  ;;  %v2517_v22 = vld [vmem:[%s4435_s13 + $0x30] sm:$0xff] }
0x1b6b   :  { %v3396_v27 = vpack.c.bf16 %v2518_v24, %v2517_v22 }
0x1c3d   :  { %v2364_v48 = vpop.f32.mrb[20].mxu1 }
0x1c3e   :  { %v2365_v49 = vadd.f32 %v2801_v47, %v2364_v48  ;;  %v3217_v50 = vpop.f32.mrb[21].mxu1  ;;  %v2539_v48 = vld [vmem:[%s4435_s13 + $0xe0] sm:$0xff] }
0x1c40   :  { %v2369_v52 = vmul.f32 %v2365_v49, %v2365_v49  ;;  %v2368_v59 = vmul.f32 0.5, %v2365_v49 }
0x1c42   :  { %v2370_v53 = vmul.f32 %v2369_v52, %v2365_v49  ;;  %v2524_v52 = vld [vmem:[%s4435_s13 + $0x68] sm:$0xff] }
0x1c44   :  { %v2371_v54 = vmul.f32 0.044715, %v2370_v53  ;;  %v2541_v53 = vld [vmem:[%s4435_s13 + $0xf0] sm:$0xff] }
0x1c46   :  { %v2372_v56 = vadd.f32 %v2371_v54, %v2365_v49  ;;  %v2540_v49 = vld [vmem:[%s4435_s13 + $0xe8] sm:$0xff]  ;;  %v2542_v54 = vld [vmem:[%s4435_s13 + $0xf8] sm:$0xff] }
0x1c47   :  { %v3411_v50 = vpack.c.bf16 %v2540_v49, %v2539_v48 }
0x1c48   :  { %v2373_v57 = vmul.f32 0.7978846, %v2372_v56 }
0x1c4a   :  { %3487 = vtanh.f32 %v2373_v57  ;;  %v3417_v57 = vpack.c.bf16 %v2542_v54, %v2541_v53 }
0x1c54   :  { %v3488_v58 = vpop.eup %3487 }
0x1c55   :  { %v2375_v60 = vadd.f32 1.0, %v3488_v58  ;;  %v2525_v58 = vld [vmem:[%s4435_s13 + $0x70] sm:$0xff] }
0x1c57   :  { %v2376_v61 = vmul.f32 %v2375_v60, %v2368_v59  ;;  %v2526_v59 = vld [vmem:[%s4435_s13 + $0x78] sm:$0xff] }
0x1c58   :  { %v3420_v60 = vpack.c.bf16 %v2526_v59, %v2525_v58 }
0x1c59   :  { %3251 = vmatmul.mubr.f32.vlgmr.msra.gmra.mrb[28].mxu0 %v2376_v61 }
0x1d2c   :  { %v2468_v62 = vpop.f32.mrb[28].mxu0 }
0x1d2d   :  { %v2469_v63 = vadd.f32 %v2820_v7, %v2468_v62  ;;  %v3252_v51 = vpop.f32.mrb[29].mxu0 }
0x1d2e   :  { %v2821_v51 = vld [vmem:[%s4414_s16] ss:$0 sm:$0xff] }
0x1d2f   :  { %v2472_v1 = vadd.f32 %v2469_v63, %v4149_v0  ;;  %v3375_v0 = vpack.c.bf16 %v2528_v4, %v2527_v3 }
0x1d31   :  { %v2484_v55 = vsel %vm118_vm3, %v2472_v1, 0.0  ;;  %3377 = vmatprep.subr.msk.bf16.mxu1 %vm4246_vm9, %v3375_v0 }
0x1d32   :  { %2485 = vadd.xlane.f32.xlu0 %v2484_v55  ;;  %3380 = vmatpush3.bf16.xpose.msk.msra.mxu1 %vm4246_vm9, %v3378_v10  ;;  %v2822_v55 = vld [vmem:[%s4415_s17] ss:$0 sm:$0xff] }
0x1d48   :  { %2474 = vrot.lane.b32.xlu0 %v4042_v30, %s3534_s15  ;;  %v3381_v30 = vpack.c.bf16 %v2530_v6, %v2529_v9 }
0x1d4a   :  { %3383 = vmatprep.subr.msk.bf16.mxu1 %vm4246_vm9, %v3381_v30 }
0x1d4b   :  { %3386 = vmatpush3.bf16.xpose.msk.msra.mxu1 %vm4246_vm9, %v3384_v14 }
0x1d4c   :  { %3389 = vmatprep.subr.msk.bf16.mxu1 %vm4246_vm9, %v3387_v15 }
0x1d53   :  { %3392 = vmatpush3.bf16.xpose.msk.msra.mxu1 %vm4246_vm9, %v3390_v20 }
0x1d54   :  { %3395 = vmatprep.subr.msk.bf16.mxu1 %vm4246_vm9, %v3393_v21 }
0x1d5b   :  { %3398 = vmatpush3.bf16.xpose.msk.msra.mxu1 %vm4246_vm9, %v3396_v27 }
0x1d5c   :  { %3401 = vmatprep.subr.msk.bf16.mxu1 %vm4246_vm9, %v3399_v37 }
0x1d63   :  { %3404 = vmatpush3.bf16.xpose.msk.msra.mxu1 %vm4246_vm9, %v3402_v34 }
0x1d64   :  { %3407 = vmatprep.subr.msk.bf16.mxu1 %vm4246_vm9, %v3405_v36 }
0x1d6b   :  { %3410 = vmatpush3.bf16.xpose.msk.msra.mxu1 %vm4246_vm9, %v3408_v40 }
0x1d6c   :  { %3413 = vmatprep.subr.msk.bf16.mxu1 %vm4246_vm9, %v3411_v50 }
0x1dbf   :  { %v2486_v41 = vpop.xlane.xlu0 %2485 }
0x1dc0   :  { %v2487_v42 = vmul.f32 0.03125, %v2486_v41 }
0x1dc2   :  { %v2488_v43 = vsub.f32 %v2472_v1, %v2487_v42 }
0x1dc3   :  { %v2475_v44 = vpop.permute.xlu0 %2474 }
0x1dc4   :  { %v2478_v33 = vsel %vm2477_vm10, %v3804_v35, %v2475_v44  ;;  %v2489_v45 = vmul.f32 %v2488_v43, %v2488_v43  ;;  %v2523_v35 = vld [vmem:[%s4435_s13 + $0x60] sm:$0xff]  ;;  %s3535_s13 = smov [#allocation2]  }
0x1dc5   :  { %v2480_v46 = vsel %vm2479_vm11, %v2478_v33, %v2475_v44  ;;  %v3414_v56 = vpack.c.bf16 %v2524_v52, %v2523_v35  ;;  %s2721_s28 = sshll.u32 %s3535_s13, 4  ;;  %s2722_s28 = int_to_ptr.vmem [resolvable:$true] %s2721_s28 }
0x1dc6   :  { %2481 = vst [vmem:[%s4417_s19] sm:$0xff] %v2480_v46  ;;  %v2490_v47 = vsel %vm118_vm3, %v2489_v45, 0.0  ;;  %s3491_s29 = scalar_lea.vmem %s2722_s28, 256  ;;  %p3496_p1 = scmp.lt.s32.totalorder %s2722_s28, %s2722_s28 }
0x1dc7   :  { %2491 = vadd.xlane.f32.xlu1 %v2490_v47  ;;  %3416 = vmatpush3.bf16.xpose.msk.msra.mxu1 %vm4246_vm9, %v3414_v56  ;;  %p3492_p0 = scmp.ne.s32.totalorder %s2722_s28, %s3491_s29  ;;  %p3497_p2 = scmp.lt.s32.totalorder %s3491_s29, %s3491_s29 }
0x1dc8   :  { %3419 = vmatprep.subr.msk.bf16.mxu1 %vm4246_vm9, %v3417_v57 }
0x1dc9   :  { %p3498_p3 = por %p3497_p2, %p3496_p1 }
0x1dcb   :  { %p3499_p4 = pnand %p3498_p3, %p3492_p0 }
0x1dcf   :  { %3422 = vmatpush3.bf16.xpose.msk.msra.mxu1 %vm4246_vm9, %v3420_v60 }
0x1e54   :  { %v2492_v61 = vpop.xlane.xlu1 %2491 }
0x1e55   :  { %v2493_v7 = vmul.f32 0.03125, %v2492_v61 }
0x1e57   :  { %v2494_v62 = vadd.f32 1e-05, %v2493_v7 }
0x1e59   :  { %3489 = vrsqrt.f32 %v2494_v62 }
0x1e63   :  { %v3490_v63 = vpop.eup %3489 }
0x1e64   :  { %v2496_v1 = vmul.f32 %v3490_v63, %v2488_v43 }
0x1e66   :  { %v2503_v3 = vmul.f32 %v2821_v51, %v2496_v1 }
0x1e68   :  { %v2510_v4 = vadd.f32 %v2822_v55, %v2503_v3 }
0x1e6a   :  { %3024 = vmatprep.mubr.msk.f32.mxu1 %vm118_vm3, %v2510_v4 }
0x1e6b   :  { %3025 = vmatmul.mubr.msk.f32.vlgmr.msra.gmra.mrb[22].mxu1 %vm118_vm3, %v2510_v4 }
0x1f3e   :  { %v2708_v23 = vpop.f32.mrb[22].mxu1 }
0x1f3f   :  { %2713 = vst [vmem:[#allocation2] sm:$0xff] %v2708_v23  ;;  %v2710_v0 = vpop.f32.mrb[23].mxu1 }
0x1f40   :  { %2714 = vst [vmem:[#allocation2 + $0x8] sm:$0xff] %v2710_v0 }
0x1f41   :  { %3502 = shalt.err (!%p3499_p4)
}
0x1f42   :  { %s3503_s8 = scalar_lea.hbm %s4416_s18, 256 }
0x1f43   :  { %p3504_p5 = scmp.ne.s32.totalorder %s4416_s18, %s3503_s8  ;;  %p3507_p6 = scmp.lt.u32.totalorder %s3503_s8, %s4416_s18 }
0x1f45   :  { %p3509_p7 = pnand %p3507_p6, %p3504_p5 }
0x1f47   :  { %3512 = shalt.err (!%p3509_p7)
}
0x1f48   :  { %2724 = dma.vmem_to_hbm [thread:$0]  %s2722_s28, 256, %s4416_s18, [#allocation3]  }
0x1f49   :  { %3513 = dma.done.wait [#allocation3], 256  }
0x1f4a   :  { %3514 = vsyncadd [#allocation3], 4294967040 }
0x1f4b   :  { %2732 = vsyncpa [#allocation3], 1 }

</bundles_post_ra>
